<compile_context>
chip_gen: v6e
topology: v6e:2x2x1
jax: 0.10.0
libtpu: 0.0.40
codegen_flags: <defaults>
</compile_context>

<pallas_src>
import jax
import jax.numpy as jnp
from jax.experimental import pallas as pl
from jax.experimental.pallas import tpu as pltpu


def cbam_kernel(x_ref, w1t_ref, w2t_ref, bpack_ref, ktT_ref, out_ref):
    # x_ref: (Bblk, C, HW) f32, NCHW-flattened (C on sublanes, HW on lanes).
    bblk = x_ref.shape[0]
    cr = w1t_ref.shape[0]

    w1t = w1t_ref[...]                 # (Cr, C)   Linear1 weight (torch layout)
    w2t = w2t_ref[...]                 # (C, Cr)   Linear2 weight (torch layout)
    b1c = bpack_ref[0:cr, 0:1]         # (Cr, 1)
    b2c = bpack_ref[:, 1:2]            # (C, 1)
    bnb = bpack_ref[0:1, 2:3]          # (1, 1)    eval-BN bias (beta - mean*gamma*rsqrt(var+eps))

    # ---------------- ChannelGate (pool_types == ['avg']) ----------------
    # Column-oriented MLP so the per-channel scale lands directly on the
    # sublane (C) axis of the NCHW image — no lane<->sublane relayout needed.
    ch_cols = []
    cmean_rows = []
    for b in range(bblk):                                   # statically unrolled, bblk <= 8
        x_img = x_ref[b].astype(jnp.float32)                # (C, HW)
        pooled = jnp.mean(x_img, axis=1, keepdims=True)     # (C, 1)  global avg-pool
        h = jnp.maximum(
            jnp.dot(w1t, pooled, preferred_element_type=jnp.float32) + b1c, 0.0)   # (Cr, 1)
        att = jnp.dot(w2t, h, preferred_element_type=jnp.float32) + b2c            # (C, 1)
        ch = jax.nn.sigmoid(att)                            # (C, 1) channel-attention scale
        ch_cols.append(ch)
        # ChannelPool: mean over channels of the channel-gated image (sublane reduce).
        cmean_rows.append(jnp.mean(x_img * ch, axis=0, keepdims=True))             # (1, HW)

    # ---------------- SpatialGate ----------------
    # 7x7 'same' conv (1->1, no bias) + eval-mode BN folded into ktT / bnb:
    # one batched, lane-dense MXU matmul over all images in the block.
    cmean = jnp.concatenate(cmean_rows, axis=0)                                     # (Bblk, HW)
    bn_out = jnp.dot(cmean, ktT_ref[...], preferred_element_type=jnp.float32) + bnb
    sp_scale = jax.nn.sigmoid(bn_out)                                               # (Bblk, HW)

    for b in range(bblk):
        x_cg = x_ref[b].astype(jnp.float32) * ch_cols[b]                            # (C, HW)
        out_ref[b] = (x_cg * sp_scale[b:b + 1, :]).astype(out_ref.dtype)


def build_conv_matrix(cw, H, W):
    """Toeplitz matrix kt (out_flat, in_flat) s.t. conv2d_same(cw, m) == kt @ m.flatten()."""
    k = cw.shape[0]
    pad = (k - 1) // 2
    i = jnp.arange(H)[:, None, None, None]    # out row
    j = jnp.arange(W)[None, :, None, None]    # out col
    ip = jnp.arange(H)[None, None, :, None]   # in row
    jp = jnp.arange(W)[None, None, None, :]   # in col
    di = ip - i + pad
    dj = jp - j + pad
    valid = (di >= 0) & (di < k) & (dj >= 0) & (dj < k)
    vals = jnp.where(valid, cw[jnp.clip(di, 0, k - 1), jnp.clip(dj, 0, k - 1)], 0.0)
    return vals.reshape(H * W, H * W).astype(jnp.float32)


def prepare_cbam_params(w1, b1, w2, b2, cw, bn, H, W):
    """One-time precompute (treated like weights, NOT inside the per-call jit):
      * Toeplitz conv matrix with the eval-mode BN scale folded in (transposed
        so the kernel does a lane-dense (Bblk,HW)@(HW,HW) matmul),
      * transposed MLP weights for the column-oriented in-kernel MLP,
      * one packed (C,3) block holding b1 | b2 | BN-bias.
    TODO(synk): training-mode BatchNorm (per-batch statistics) not reproduced; eval-mode used.
    """
    C, Cr = w1.shape
    gamma, beta, rmean, rvar = bn[0], bn[1], bn[2], bn[3]
    s = gamma * jax.lax.rsqrt(rvar + 1e-5)
    kt = build_conv_matrix(cw, H, W)                      # (HW_out, HW_in)
    ktT = (kt * s).T.astype(jnp.float32)                  # (HW_in, HW_out), BN scale folded
    bn_bias = beta - rmean * s
    bpack = jnp.zeros((C, 3), jnp.float32)
    bpack = bpack.at[:Cr, 0].set(b1.reshape(-1).astype(jnp.float32))
    bpack = bpack.at[:, 1].set(b2.reshape(-1).astype(jnp.float32))
    bpack = bpack.at[0, 2].set(bn_bias)
    return (jnp.asarray(w1.T, jnp.float32),               # (Cr, C)
            jnp.asarray(w2.T, jnp.float32),               # (C, Cr)
            bpack, ktT)


@jax.jit
def cbam_forward(x, w1t, w2t, bpack, ktT):
    B, C, H, W = x.shape
    HW = H * W
    Cr = w1t.shape[0]

    # Images per grid step: fold the (small) batch into one step on single-TC
    # v5e/v6e (per-step overhead dominates at this size); on v7x split into at
    # least 2 "parallel" steps so both TensorCores get work.
    ipb = min(B, 8)
    try:
        if B > 1 and "v7" in jax.devices()[0].device_kind.lower():
            ipb = min(ipb, pl.cdiv(B, 2))
    except Exception:
        pass
    while B % ipb:
        ipb -= 1

    # Contiguous-dims reshape only — no NCHW<->NHWC transpose in the wrapper.
    x2 = x.reshape(B, C, HW)

    out = pl.pallas_call(
        cbam_kernel,
        out_shape=jax.ShapeDtypeStruct((B, C, HW), x.dtype),
        grid=(B // ipb,),
        in_specs=[
            pl.BlockSpec((ipb, C, HW), lambda b: (b, 0, 0)),   # x (NCHW-flat)
            pl.BlockSpec((Cr, C), lambda b: (0, 0)),           # w1^T
            pl.BlockSpec((C, Cr), lambda b: (0, 0)),           # w2^T
            pl.BlockSpec((C, 3), lambda b: (0, 0)),            # [b1 | b2 | bn_bias]
            pl.BlockSpec((HW, HW), lambda b: (0, 0)),          # BN-scaled Toeplitz conv matrix
        ],
        out_specs=pl.BlockSpec((ipb, C, HW), lambda b: (b, 0, 0)),
        compiler_params=pltpu.CompilerParams(
            dimension_semantics=("parallel",)),
        # Scale-up: raise vmem_limit_bytes / single-buffer (pl.Buffered(1)) or
        # bf16 the ktT block before using this at HW >~ 1k.
    )(x2, w1t, w2t, bpack, ktT)

    return out.reshape(B, C, H, W)


def cbam_reference(x, w1, b1, w2, b2, cw, bn):
    """Pure-JAX reference mirroring the PyTorch module (NCHW, eval-mode BN)."""
    pooled = jnp.mean(x, axis=(2, 3))
    h = jax.nn.relu(pooled @ w1 + b1)
    att = h @ w2 + b2
    x_cg = x * jax.nn.sigmoid(att)[:, :, None, None]
    cmean = jnp.mean(x_cg, axis=1, keepdims=True)
    conv = jax.lax.conv_general_dilated(
        cmean, cw[None, None], window_strides=(1, 1), padding=((3, 3), (3, 3)))
    bn_out = bn[0] * (conv - bn[2]) * jax.lax.rsqrt(bn[3] + 1e-5) + bn[1]
    return x_cg * jax.nn.sigmoid(bn_out)


if __name__ == "__main__":
    B, C, H, W = 2, 128, 8, 8          # gate_channels=128 (module default)
    Cr = C // 16                       # reduction_ratio=16 -> 8

    key = jax.random.PRNGKey(0)
    k1, k2, k3, k4, k5, kx = jax.random.split(key, 6)

    # Deterministic parameter init (PyTorch-style uniform bounds).
    bound1 = 1.0 / (C ** 0.5)
    w1 = jax.random.uniform(k1, (C, Cr), jnp.float32, -bound1, bound1)   # Linear1 W^T
    b1 = jax.random.uniform(k2, (Cr,), jnp.float32, -bound1, bound1)
    bound2 = 1.0 / (Cr ** 0.5)
    w2 = jax.random.uniform(k3, (Cr, C), jnp.float32, -bound2, bound2)   # Linear2 W^T
    b2 = jax.random.uniform(k4, (C,), jnp.float32, -bound2, bound2)
    cw = jax.random.uniform(k5, (7, 7), jnp.float32, -1.0 / 7.0, 1.0 / 7.0)  # 7x7, 1->1, no bias
    # BatchNorm2d(1) eval-mode params: [gamma, beta, running_mean, running_var]
    bn = jnp.array([1.3, 0.1, 0.05, 0.9], dtype=jnp.float32)

    x = jax.random.normal(kx, (B, C, H, W), dtype=jnp.float32)

    # One-time precompute, outside the jitted per-call forward.
    w1t, w2t, bpack, ktT = prepare_cbam_params(w1, b1, w2, b2, cw, bn, H, W)

    out = jax.block_until_ready(cbam_forward(x, w1t, w2t, bpack, ktT))
    ref = jax.block_until_ready(cbam_reference(x, w1, b1, w2, b2, cw, bn))

    assert out.shape == (B, C, H, W)
    assert bool(jnp.allclose(out, ref, atol=2e-4, rtol=2e-4)), "mismatch vs reference"

    print("KERNEL_OK")
</pallas_src>

<mosaic_0001>
module attributes {stable_mosaic.version = 11 : i64} {
  func.func @cbam_kernel(%arg0: i32, %arg1: memref<2x128x64xf32, #tpu.memory_space<vmem>>, %arg2: memref<8x128xf32, #tpu.memory_space<vmem>>, %arg3: memref<128x8xf32, #tpu.memory_space<vmem>>, %arg4: memref<128x3xf32, #tpu.memory_space<vmem>>, %arg5: memref<64x64xf32, #tpu.memory_space<vmem>>, %arg6: memref<2x128x64xf32, #tpu.memory_space<vmem>>) attributes {dimension_semantics = [#tpu.dimension_semantics<parallel>], iteration_bounds = array<i64: 1>, scalar_prefetch = 0 : i64, scratch_operands = 0 : i64, tpu.core_type = #tpu.core_type<tc>, window_params = [{transform_indices = @transform_0, window_bounds = array<i64: 2, 128, 64>}, {pipeline_mode = #tpu.pipeline_mode<synchronous>, transform_indices = @transform_1, window_bounds = array<i64: 8, 128>}, {pipeline_mode = #tpu.pipeline_mode<synchronous>, transform_indices = @transform_2, window_bounds = array<i64: 128, 8>}, {pipeline_mode = #tpu.pipeline_mode<synchronous>, transform_indices = @transform_3, window_bounds = array<i64: 128, 3>}, {pipeline_mode = #tpu.pipeline_mode<synchronous>, transform_indices = @transform_4, window_bounds = array<i64: 64, 64>}, {transform_indices = @transform_5, window_bounds = array<i64: 2, 128, 64>}]} {
    %c0 = arith.constant 0 : index
    %c0_0 = arith.constant 0 : index
    %0 = vector.load %arg2[%c0, %c0_0] : memref<8x128xf32, #tpu.memory_space<vmem>>, vector<8x128xf32>
    %c0_1 = arith.constant 0 : index
    %c0_2 = arith.constant 0 : index
    %1 = vector.load %arg3[%c0_1, %c0_2] : memref<128x8xf32, #tpu.memory_space<vmem>>, vector<128x8xf32>
    %c0_3 = arith.constant 0 : index
    %c0_4 = arith.constant 0 : index
    %2 = vector.load %arg4[%c0_3, %c0_4] : memref<128x3xf32, #tpu.memory_space<vmem>>, vector<8x1xf32>
    %c0_5 = arith.constant 0 : index
    %c1 = arith.constant 1 : index
    %3 = vector.load %arg4[%c0_5, %c1] : memref<128x3xf32, #tpu.memory_space<vmem>>, vector<128x1xf32>
    %c0_6 = arith.constant 0 : index
    %c2 = arith.constant 2 : index
    %4 = vector.load %arg4[%c0_6, %c2] : memref<128x3xf32, #tpu.memory_space<vmem>>, vector<1x1xf32>
    %c0_7 = arith.constant 0 : index
    %c0_8 = arith.constant 0 : index
    %c0_9 = arith.constant 0 : index
    %5 = vector.load %arg1[%c0_7, %c0_8, %c0_9] : memref<2x128x64xf32, #tpu.memory_space<vmem>>, vector<1x128x64xf32>
    %6 = vector.shape_cast %5 : vector<1x128x64xf32> to vector<128x64xf32>
    %cst = arith.constant dense<0.000000e+00> : vector<128xf32>
    %7 = vector.multi_reduction <add>, %6, %cst [1] : vector<128x64xf32> to vector<128xf32>
    %8 = vector.shape_cast %7 : vector<128xf32> to vector<128x1xf32>
    %cst_10 = arith.constant 6.400000e+01 : f32
    %9 = vector.broadcast %cst_10 : f32 to vector<128x1xf32>
    %10 = arith.divf %8, %9 : vector<128x1xf32>
    %cst_11 = arith.constant dense<0.000000e+00> : vector<8x1xf32>
    %11 = tpu.matmul %0, %10, %cst_11 {dimension_numbers = #tpu.dot_dimension_numbers<[1], [0], [0], [1], [0, 0, 1, 1], [], []>} : vector<8x128xf32>, vector<128x1xf32>, vector<8x1xf32> -> vector<8x1xf32>
    %12 = arith.addf %11, %2 : vector<8x1xf32>
    %cst_12 = arith.constant 0.000000e+00 : f32
    %13 = vector.broadcast %cst_12 : f32 to vector<8x1xf32>
    %14 = arith.maximumf %12, %13 : vector<8x1xf32>
    %cst_13 = arith.constant dense<0.000000e+00> : vector<128x1xf32>
    %15 = tpu.matmul %1, %14, %cst_13 {dimension_numbers = #tpu.dot_dimension_numbers<[1], [0], [0], [1], [0, 0, 1, 1], [], []>} : vector<128x8xf32>, vector<8x1xf32>, vector<128x1xf32> -> vector<128x1xf32>
    %16 = arith.addf %15, %3 : vector<128x1xf32>
    %17 = arith.negf %16 : vector<128x1xf32>
    %18 = math.exp %17 : vector<128x1xf32>
    %cst_14 = arith.constant 1.000000e+00 : f32
    %19 = vector.broadcast %cst_14 : f32 to vector<128x1xf32>
    %20 = arith.addf %19, %18 : vector<128x1xf32>
    %21 = arith.divf %19, %20 : vector<128x1xf32>
    %22 = vector.broadcast %21 : vector<128x1xf32> to vector<128x64xf32>
    %23 = arith.mulf %6, %22 : vector<128x64xf32>
    %cst_15 = arith.constant dense<0.000000e+00> : vector<64xf32>
    %24 = vector.multi_reduction <add>, %23, %cst_15 [0] : vector<128x64xf32> to vector<64xf32>
    %25 = vector.shape_cast %24 : vector<64xf32> to vector<1x64xf32>
    %cst_16 = arith.constant 1.280000e+02 : f32
    %26 = vector.broadcast %cst_16 : f32 to vector<1x64xf32>
    %27 = arith.divf %25, %26 : vector<1x64xf32>
    %c1_17 = arith.constant 1 : index
    %c0_18 = arith.constant 0 : index
    %c0_19 = arith.constant 0 : index
    %28 = vector.load %arg1[%c1_17, %c0_18, %c0_19] : memref<2x128x64xf32, #tpu.memory_space<vmem>>, vector<1x128x64xf32>
    %29 = vector.shape_cast %28 : vector<1x128x64xf32> to vector<128x64xf32>
    %cst_20 = arith.constant dense<0.000000e+00> : vector<128xf32>
    %30 = vector.multi_reduction <add>, %29, %cst_20 [1] : vector<128x64xf32> to vector<128xf32>
    %31 = vector.shape_cast %30 : vector<128xf32> to vector<128x1xf32>
    %cst_21 = arith.constant 6.400000e+01 : f32
    %32 = vector.broadcast %cst_21 : f32 to vector<128x1xf32>
    %33 = arith.divf %31, %32 : vector<128x1xf32>
    %cst_22 = arith.constant dense<0.000000e+00> : vector<8x1xf32>
    %34 = tpu.matmul %0, %33, %cst_22 {dimension_numbers = #tpu.dot_dimension_numbers<[1], [0], [0], [1], [0, 0, 1, 1], [], []>} : vector<8x128xf32>, vector<128x1xf32>, vector<8x1xf32> -> vector<8x1xf32>
    %35 = arith.addf %34, %2 : vector<8x1xf32>
    %cst_23 = arith.constant 0.000000e+00 : f32
    %36 = vector.broadcast %cst_23 : f32 to vector<8x1xf32>
    %37 = arith.maximumf %35, %36 : vector<8x1xf32>
    %cst_24 = arith.constant dense<0.000000e+00> : vector<128x1xf32>
    %38 = tpu.matmul %1, %37, %cst_24 {dimension_numbers = #tpu.dot_dimension_numbers<[1], [0], [0], [1], [0, 0, 1, 1], [], []>} : vector<128x8xf32>, vector<8x1xf32>, vector<128x1xf32> -> vector<128x1xf32>
    %39 = arith.addf %38, %3 : vector<128x1xf32>
    %40 = arith.negf %39 : vector<128x1xf32>
    %41 = math.exp %40 : vector<128x1xf32>
    %cst_25 = arith.constant 1.000000e+00 : f32
    %42 = vector.broadcast %cst_25 : f32 to vector<128x1xf32>
    %43 = arith.addf %42, %41 : vector<128x1xf32>
    %44 = arith.divf %42, %43 : vector<128x1xf32>
    %45 = vector.broadcast %44 : vector<128x1xf32> to vector<128x64xf32>
    %46 = arith.mulf %29, %45 : vector<128x64xf32>
    %cst_26 = arith.constant dense<0.000000e+00> : vector<64xf32>
    %47 = vector.multi_reduction <add>, %46, %cst_26 [0] : vector<128x64xf32> to vector<64xf32>
    %48 = vector.shape_cast %47 : vector<64xf32> to vector<1x64xf32>
    %cst_27 = arith.constant 1.280000e+02 : f32
    %49 = vector.broadcast %cst_27 : f32 to vector<1x64xf32>
    %50 = arith.divf %48, %49 : vector<1x64xf32>
    %51 = tpu.concatenate %27, %50 in 0 : vector<1x64xf32>, vector<1x64xf32> -> vector<2x64xf32>
    %c0_28 = arith.constant 0 : index
    %c0_29 = arith.constant 0 : index
    %52 = vector.load %arg5[%c0_28, %c0_29] : memref<64x64xf32, #tpu.memory_space<vmem>>, vector<64x64xf32>
    %cst_30 = arith.constant dense<0.000000e+00> : vector<2x64xf32>
    %53 = tpu.matmul %51, %52, %cst_30 {dimension_numbers = #tpu.dot_dimension_numbers<[1], [0], [0], [1], [0, 0, 1, 1], [], []>} : vector<2x64xf32>, vector<64x64xf32>, vector<2x64xf32> -> vector<2x64xf32>
    %54 = vector.broadcast %4 : vector<1x1xf32> to vector<2x64xf32>
    %55 = arith.addf %53, %54 : vector<2x64xf32>
    %56 = arith.negf %55 : vector<2x64xf32>
    %57 = math.exp %56 : vector<2x64xf32>
    %cst_31 = arith.constant 1.000000e+00 : f32
    %58 = vector.broadcast %cst_31 : f32 to vector<2x64xf32>
    %59 = arith.addf %58, %57 : vector<2x64xf32>
    %60 = arith.divf %58, %59 : vector<2x64xf32>
    %c0_32 = arith.constant 0 : index
    %c0_33 = arith.constant 0 : index
    %c0_34 = arith.constant 0 : index
    %61 = vector.load %arg1[%c0_32, %c0_33, %c0_34] : memref<2x128x64xf32, #tpu.memory_space<vmem>>, vector<1x128x64xf32>
    %62 = vector.shape_cast %61 : vector<1x128x64xf32> to vector<128x64xf32>
    %63 = vector.broadcast %21 : vector<128x1xf32> to vector<128x64xf32>
    %64 = arith.mulf %62, %63 : vector<128x64xf32>
    %65 = vector.extract_strided_slice %60 {offsets = [0, 0], sizes = [1, 64], strides = [1, 1]} : vector<2x64xf32> to vector<1x64xf32>
    %66 = vector.broadcast %65 : vector<1x64xf32> to vector<128x64xf32>
    %67 = arith.mulf %64, %66 : vector<128x64xf32>
    %c0_35 = arith.constant 0 : index
    %c0_36 = arith.constant 0 : index
    %c0_37 = arith.constant 0 : index
    %68 = vector.load %arg6[%c0_35, %c0_36, %c0_37] : memref<2x128x64xf32, #tpu.memory_space<vmem>>, vector<1x128x64xf32>
    %69 = vector.shape_cast %68 : vector<1x128x64xf32> to vector<128x64xf32>
    %70 = vector.shape_cast %67 : vector<128x64xf32> to vector<1x128x64xf32>
    tpu.vector_store %arg6[%c0_35, %c0_36, %c0_37], %70 {strides = array<i32>} : memref<2x128x64xf32, #tpu.memory_space<vmem>>, vector<1x128x64xf32>,
    %c1_38 = arith.constant 1 : index
    %c0_39 = arith.constant 0 : index
    %c0_40 = arith.constant 0 : index
    %71 = vector.load %arg1[%c1_38, %c0_39, %c0_40] : memref<2x128x64xf32, #tpu.memory_space<vmem>>, vector<1x128x64xf32>
    %72 = vector.shape_cast %71 : vector<1x128x64xf32> to vector<128x64xf32>
    %73 = vector.broadcast %44 : vector<128x1xf32> to vector<128x64xf32>
    %74 = arith.mulf %72, %73 : vector<128x64xf32>
    %75 = vector.extract_strided_slice %60 {offsets = [1, 0], sizes = [1, 64], strides = [1, 1]} : vector<2x64xf32> to vector<1x64xf32>
    %76 = vector.broadcast %75 : vector<1x64xf32> to vector<128x64xf32>
    %77 = arith.mulf %74, %76 : vector<128x64xf32>
    %c1_41 = arith.constant 1 : index
    %c0_42 = arith.constant 0 : index
    %c0_43 = arith.constant 0 : index
    %78 = vector.load %arg6[%c1_41, %c0_42, %c0_43] : memref<2x128x64xf32, #tpu.memory_space<vmem>>, vector<1x128x64xf32>
    %79 = vector.shape_cast %78 : vector<1x128x64xf32> to vector<128x64xf32>
    %80 = vector.shape_cast %77 : vector<128x64xf32> to vector<1x128x64xf32>
    tpu.vector_store %arg6[%c1_41, %c0_42, %c0_43], %80 {strides = array<i32>} : memref<2x128x64xf32, #tpu.memory_space<vmem>>, vector<1x128x64xf32>,
    return
  }
  func.func @transform_0(%arg0: i32) -> (i32, i32, i32) {
    %c0_i32 = arith.constant 0 : i32
    %c0_i32_0 = arith.constant 0 : i32
    %c0_i32_1 = arith.constant 0 : i32
    return %arg0, %c0_i32, %c0_i32_0 : i32, i32, i32
  }
  func.func @transform_1(%arg0: i32) -> (i32, i32) {
    %c0_i32 = arith.constant 0 : i32
    %c0_i32_0 = arith.constant 0 : i32
    %c0_i32_1 = arith.constant 0 : i32
    return %c0_i32, %c0_i32_0 : i32, i32
  }
  func.func @transform_2(%arg0: i32) -> (i32, i32) {
    %c0_i32 = arith.constant 0 : i32
    %c0_i32_0 = arith.constant 0 : i32
    %c0_i32_1 = arith.constant 0 : i32
    return %c0_i32, %c0_i32_0 : i32, i32
  }
  func.func @transform_3(%arg0: i32) -> (i32, i32) {
    %c0_i32 = arith.constant 0 : i32
    %c0_i32_0 = arith.constant 0 : i32
    %c0_i32_1 = arith.constant 0 : i32
    return %c0_i32, %c0_i32_0 : i32, i32
  }
  func.func @transform_4(%arg0: i32) -> (i32, i32) {
    %c0_i32 = arith.constant 0 : i32
    %c0_i32_0 = arith.constant 0 : i32
    %c0_i32_1 = arith.constant 0 : i32
    return %c0_i32, %c0_i32_0 : i32, i32
  }
  func.func @transform_5(%arg0: i32) -> (i32, i32, i32) {
    %c0_i32 = arith.constant 0 : i32
    %c0_i32_0 = arith.constant 0 : i32
    %c0_i32_1 = arith.constant 0 : i32
    return %arg0, %c0_i32, %c0_i32_0 : i32, i32, i32
  }
}

</mosaic_0001>

<bundles_post_ra>
// kernel: cbam_forward.1
= control target key start
LH: loop header
LB: loop body
LE: loop exit
PB: predicated region body
PF: predicated region fallthrough
CT: control target
= control target key end

     0   :  { %vm70_vm0 = vcmask 523264   ;;  %v1932_v18 = vmov 0.0   ;;  %vm1933_vm1 = vmmov 0   ;;  %vm271_vm2 = vcmask 64512   ;;  %s1934_s14 = smov 127   ;;  %s2876_s0 = inlined_call_operand.vmem [shape: f32[2,128,64], index: 0, kind: input, shape index: {}]   ;;  %s2877_s1 = inlined_call_operand.vmem [shape: f32[8,128], index: 1, kind: input, shape index: {}]   ;;  %s2878_s2 = inlined_call_operand.vmem [shape: f32[128,8], index: 2, kind: input, shape index: {}]   ;;  %s2879_s3 = inlined_call_operand.vmem [shape: f32[128,3], index: 3, kind: input, shape index: {}]   ;;  %s2880_s4 = inlined_call_operand.vmem [shape: f32[64,64], index: 4, kind: input, shape index: {}]   ;;  %s2881_s5 = inlined_call_operand.vmem [shape: f32[2,128,64], index: 5, kind: output, shape index: {}]  }
   0x1   :  { %v69_v0 = vld [vmem:[%s2876_s0 + $0x78] sm:$0xff]  ;;  %v68_v1 = vld [vmem:[%s2876_s0 + $0x70] sm:$0xff]  ;;  %v67_v2 = vld [vmem:[%s2876_s0 + $0x68] sm:$0xff]  ;;  %1618 = vmatprep.subr.mxu0 %v1932_v18  ;;  %1650 = vmatprep.mubr.msk.f32.mxu0 %vm1933_vm1, %v1932_v18  ;;  %vm1223_vm3 = vcmask 1040384  }
   0x2   :  { %v116_v3 = vsel %vm70_vm0, %v69_v0, 0.0  ;;  %v110_v4 = vsel %vm70_vm0, %v67_v2, 0.0  ;;  %v66_v5 = vld [vmem:[%s2876_s0 + $0x60] sm:$0xff]  ;;  %v113_v6 = vsel %vm70_vm0, %v68_v1, 0.0  ;;  %v65_v8 = vld [vmem:[%s2876_s0 + $0x58] sm:$0xff]  ;;  %v64_v9 = vld [vmem:[%s2876_s0 + $0x50] sm:$0xff] }
   0x3   :  { %117 = vadd.xlane.f32.xlu0 %v116_v3  ;;  %111 = vadd.xlane.f32.xlu1 %v110_v4  ;;  %v107_v7 = vsel %vm70_vm0, %v66_v5, 0.0  ;;  %v104_v10 = vsel %vm70_vm0, %v65_v8, 0.0  ;;  %v101_v11 = vsel %vm70_vm0, %v64_v9, 0.0  ;;  %v63_v12 = vld [vmem:[%s2876_s0 + $0x48] sm:$0xff]  ;;  %v62_v13 = vld [vmem:[%s2876_s0 + $0x40] sm:$0xff]  ;;  %v61_v16 = vld [vmem:[%s2876_s0 + $0x38] sm:$0xff] }
   0x4   :  { %v98_v14 = vsel %vm70_vm0, %v63_v12, 0.0  ;;  %v95_v15 = vsel %vm70_vm0, %v62_v13, 0.0  ;;  %v60_v17 = vld [vmem:[%s2876_s0 + $0x30] sm:$0xff]  ;;  %v92_v19 = vsel %vm70_vm0, %v61_v16, 0.0  ;;  %v59_v21 = vld [vmem:[%s2876_s0 + $0x28] sm:$0xff]  ;;  %v58_v22 = vld [vmem:[%s2876_s0 + $0x20] sm:$0xff] }
   0x5   :  { %v89_v20 = vsel %vm70_vm0, %v60_v17, 0.0  ;;  %v86_v23 = vsel %vm70_vm0, %v59_v21, 0.0  ;;  %v83_v24 = vsel %vm70_vm0, %v58_v22, 0.0  ;;  %v57_v25 = vld [vmem:[%s2876_s0 + $0x18] sm:$0xff]  ;;  %v56_v26 = vld [vmem:[%s2876_s0 + $0x10] sm:$0xff]  ;;  %v55_v29 = vld [vmem:[%s2876_s0 + $0x8] sm:$0xff] }
   0x6   :  { %v80_v27 = vsel %vm70_vm0, %v57_v25, 0.0  ;;  %v77_v28 = vsel %vm70_vm0, %v56_v26, 0.0  ;;  %v54_v30 = vld [vmem:[%s2876_s0] sm:$0xff]  ;;  %v74_v31 = vsel %vm70_vm0, %v55_v29, 0.0  ;;  %v1474_v33 = vld [vmem:[%s2876_s0 + $0xf8] sm:$0xff]  ;;  %v1473_v34 = vld [vmem:[%s2876_s0 + $0xf0] sm:$0xff] }
   0x7   :  { %114 = vadd.xlane.f32.xlu0 %v113_v6  ;;  %108 = vadd.xlane.f32.xlu1 %v107_v7  ;;  %v71_v32 = vsel %vm70_vm0, %v54_v30, 0.0  ;;  %v1472_v35 = vld [vmem:[%s2876_s0 + $0xe8] sm:$0xff]  ;;  %v758_v36 = vsel %vm70_vm0, %v1474_v33, 0.0  ;;  %v755_v37 = vsel %vm70_vm0, %v1473_v34, 0.0  ;;  %v1471_v38 = vld [vmem:[%s2876_s0 + $0xe0] sm:$0xff]  ;;  %v1470_v41 = vld [vmem:[%s2876_s0 + $0xd8] sm:$0xff] }
   0x8   :  { %v752_v39 = vsel %vm70_vm0, %v1472_v35, 0.0  ;;  %v749_v40 = vsel %vm70_vm0, %v1471_v38, 0.0  ;;  %v1469_v42 = vld [vmem:[%s2876_s0 + $0xd0] sm:$0xff]  ;;  %v746_v43 = vsel %vm70_vm0, %v1470_v41, 0.0  ;;  %v1468_v45 = vld [vmem:[%s2876_s0 + $0xc8] sm:$0xff]  ;;  %v1467_v46 = vld [vmem:[%s2876_s0 + $0xc0] sm:$0xff] }
   0x9   :  { %v743_v44 = vsel %vm70_vm0, %v1469_v42, 0.0  ;;  %v740_v47 = vsel %vm70_vm0, %v1468_v45, 0.0  ;;  %v737_v48 = vsel %vm70_vm0, %v1467_v46, 0.0  ;;  %v1466_v49 = vld [vmem:[%s2876_s0 + $0xb8] sm:$0xff]  ;;  %v1465_v50 = vld [vmem:[%s2876_s0 + $0xb0] sm:$0xff]  ;;  %v1464_v53 = vld [vmem:[%s2876_s0 + $0xa8] sm:$0xff] }
   0xa   :  { %v734_v51 = vsel %vm70_vm0, %v1466_v49, 0.0  ;;  %v731_v52 = vsel %vm70_vm0, %v1465_v50, 0.0  ;;  %v1463_v54 = vld [vmem:[%s2876_s0 + $0xa0] sm:$0xff]  ;;  %v728_v55 = vsel %vm70_vm0, %v1464_v53, 0.0  ;;  %v1462_v57 = vld [vmem:[%s2876_s0 + $0x98] sm:$0xff]  ;;  %v1461_v58 = vld [vmem:[%s2876_s0 + $0x90] sm:$0xff] }
   0xb   :  { %105 = vadd.xlane.f32.xlu0 %v104_v10  ;;  %102 = vadd.xlane.f32.xlu1 %v101_v11  ;;  %v725_v56 = vsel %vm70_vm0, %v1463_v54, 0.0  ;;  %v722_v59 = vsel %vm70_vm0, %v1462_v57, 0.0  ;;  %v719_v60 = vsel %vm70_vm0, %v1461_v58, 0.0  ;;  %v1460_v61 = vld [vmem:[%s2876_s0 + $0x88] sm:$0xff]  ;;  %v1459_v62 = vld [vmem:[%s2876_s0 + $0x80] sm:$0xff]  ;;  %v39_v38 = vld [vmem:[%s2879_s3 + $0x10] sm:$0xff] }
   0xc   :  { %v716_v63 = vsel %vm70_vm0, %v1460_v61, 0.0  ;;  %v713_v0 = vsel %vm70_vm0, %v1459_v62, 0.0  ;;  %v2115_v34 = vld [vmem:[%s2877_s1] sm:$0xff]  ;;  %v43_v41 = vld [vmem:[%s2879_s3 + $0x30] sm:$0xff]  ;;  %v42_v42 = vld [vmem:[%s2879_s3 + $0x28] sm:$0xff]  ;;  %s1936_s1 = smov 126  }
   0xd   :  { %v21_v35 = vld [vmem:[%s2878_s2] sm:$0xff]  ;;  %v47_v45 = vld [vmem:[%s2879_s3 + $0x50] sm:$0xff]  ;;  %v46_v46 = vld [vmem:[%s2879_s3 + $0x48] sm:$0xff] }
   0xe   :  { %1655 = vmatprep.mubr.msk.f32.mxu1 %vm271_vm2, %v21_v35  ;;  %v51_v49 = vld [vmem:[%s2879_s3 + $0x70] sm:$0xff]  ;;  %v50_v50 = vld [vmem:[%s2879_s3 + $0x68] sm:$0xff] }
   0xf   :  { %99 = vadd.xlane.f32.xlu0 %v98_v14  ;;  %96 = vadd.xlane.f32.xlu1 %v95_v15 }
  0x13   :  { %93 = vadd.xlane.f32.xlu0 %v92_v19  ;;  %90 = vadd.xlane.f32.xlu1 %v89_v20 }
  0x17   :  { %87 = vadd.xlane.f32.xlu0 %v86_v23  ;;  %84 = vadd.xlane.f32.xlu1 %v83_v24 }
  0x1b   :  { %81 = vadd.xlane.f32.xlu0 %v80_v27  ;;  %78 = vadd.xlane.f32.xlu1 %v77_v28 }
  0x1f   :  { %75 = vadd.xlane.f32.xlu0 %v74_v31  ;;  %72 = vadd.xlane.f32.xlu1 %v71_v32 }
  0x23   :  { %759 = vadd.xlane.f32.xlu0 %v758_v36  ;;  %756 = vadd.xlane.f32.xlu1 %v755_v37  ;;  %v2127_v36 = vld [vmem:[%s2879_s3] sm:$0xff]  ;;  %v38_v37 = vld [vmem:[%s2879_s3 + $0x8] sm:$0xff] }
  0x27   :  { %753 = vadd.xlane.f32.xlu0 %v752_v39  ;;  %750 = vadd.xlane.f32.xlu1 %v749_v40  ;;  %v41_v39 = vld [vmem:[%s2879_s3 + $0x20] sm:$0xff]  ;;  %v40_v40 = vld [vmem:[%s2879_s3 + $0x18] sm:$0xff] }
  0x2b   :  { %747 = vadd.xlane.f32.xlu0 %v746_v43  ;;  %744 = vadd.xlane.f32.xlu1 %v743_v44  ;;  %v45_v43 = vld [vmem:[%s2879_s3 + $0x40] sm:$0xff]  ;;  %v44_v44 = vld [vmem:[%s2879_s3 + $0x38] sm:$0xff] }
  0x2f   :  { %741 = vadd.xlane.f32.xlu0 %v740_v47  ;;  %738 = vadd.xlane.f32.xlu1 %v737_v48  ;;  %v49_v47 = vld [vmem:[%s2879_s3 + $0x60] sm:$0xff]  ;;  %v48_v48 = vld [vmem:[%s2879_s3 + $0x58] sm:$0xff] }
  0x33   :  { %735 = vadd.xlane.f32.xlu0 %v734_v51  ;;  %732 = vadd.xlane.f32.xlu1 %v731_v52  ;;  %v52_v51 = vld [vmem:[%s2879_s3 + $0x78] sm:$0xff] }
  0x37   :  { %729 = vadd.xlane.f32.xlu0 %v728_v55  ;;  %726 = vadd.xlane.f32.xlu1 %v725_v56 }
  0x3b   :  { %723 = vadd.xlane.f32.xlu0 %v722_v59  ;;  %720 = vadd.xlane.f32.xlu1 %v719_v60 }
  0x3f   :  { %717 = vadd.xlane.f32.xlu0 %v716_v63  ;;  %714 = vadd.xlane.f32.xlu1 %v713_v0  ;;  %v2195_v63 = vld [vmem:[%s2878_s2 + $0x8] sm:$0xff]  ;;  %v2200_v0 = vld [vmem:[%s2878_s2 + $0x10] sm:$0xff] }
  0x50   :  { %225 = vrot.lane.b32.xlu1 %v38_v37, %s1934_s14 }
  0x54   :  { %227 = vrot.lane.b32.xlu1 %v39_v38, %s1934_s14 }
  0x55   :  { %223 = vrot.lane.b32.xlu0 %v2127_v36, %s1934_s14 }
  0x58   :  { %229 = vrot.lane.b32.xlu1 %v40_v40, %s1934_s14  ;;  %v2306_v40 = vld [vmem:[%s2878_s2 + $0x78] sm:$0xff] }
  0x59   :  { %231 = vrot.lane.b32.xlu0 %v41_v39, %s1934_s14 }
  0x5c   :  { %233 = vrot.lane.b32.xlu1 %v42_v42, %s1934_s14  ;;  %v1935_v42 = vmov 0  }
  0x5d   :  { %235 = vrot.lane.b32.xlu0 %v43_v41, %s1934_s14  ;;  %1766 = vset.pattern.permute.xlu1 %v1935_v42 }
  0x5e   :  { %1767 = vset.pattern.permute.xlu0 %v1935_v42 }
  0x60   :  { %237 = vrot.lane.b32.xlu1 %v44_v44, %s1934_s14 }
  0x61   :  { %239 = vrot.lane.b32.xlu0 %v45_v43, %s1934_s14 }
  0x64   :  { %241 = vrot.lane.b32.xlu1 %v46_v46, %s1934_s14 }
  0x65   :  { %243 = vrot.lane.b32.xlu0 %v47_v45, %s1934_s14 }
  0x68   :  { %245 = vrot.lane.b32.xlu1 %v48_v48, %s1934_s14 }
  0x69   :  { %247 = vrot.lane.b32.xlu0 %v49_v47, %s1934_s14 }
  0x6c   :  { %249 = vrot.lane.b32.xlu1 %v50_v50, %s1934_s14 }
  0x6d   :  { %251 = vrot.lane.b32.xlu0 %v51_v49, %s1934_s14 }
  0x70   :  { %253 = vrot.lane.b32.xlu1 %v52_v51, %s1934_s14 }
  0x8c   :  { %v118_v1 = vpop.xlane.xlu0 %117  ;;  %v112_v2 = vpop.xlane.xlu1 %111 }
  0x8d   :  { %v135_v3 = vmul.f32 0.015625, %v118_v1  ;;  %v133_v7 = vmul.f32 0.015625, %v112_v2 }
  0x8f   :  { %1619 = vmatpush3.msra.mxu0 %v135_v3 }
  0x90   :  { %v115_v4 = vpop.xlane.xlu0 %114  ;;  %1620 = vmatprep.subr.mxu0 %v1932_v18  ;;  %v109_v5 = vpop.xlane.xlu1 %108 }
  0x91   :  { %v134_v6 = vmul.f32 0.015625, %v115_v4  ;;  %v132_v8 = vmul.f32 0.015625, %v109_v5  ;;  %v2210_v5 = vld [vmem:[%s2878_s2 + $0x18] sm:$0xff] }
  0x93   :  { %1621 = vmatpush3.msra.mxu0 %v134_v6  ;;  %v2216_v6 = vld [vmem:[%s2878_s2 + $0x20] sm:$0xff] }
  0x94   :  { %1622 = vmatprep.subr.mxu0 %v1932_v18  ;;  %v106_v9 = vpop.xlane.xlu0 %105  ;;  %v103_v10 = vpop.xlane.xlu1 %102 }
  0x95   :  { %1623 = vmatpush3.msra.mxu0 %v133_v7  ;;  %v131_v11 = vmul.f32 0.015625, %v106_v9  ;;  %v130_v12 = vmul.f32 0.015625, %v103_v10  ;;  %v2226_v10 = vld [vmem:[%s2878_s2 + $0x28] sm:$0xff] }
  0x96   :  { %1624 = vmatprep.subr.mxu0 %v1932_v18 }
  0x97   :  { %1625 = vmatpush3.msra.mxu0 %v132_v8 }
  0x98   :  { %1626 = vmatprep.subr.mxu0 %v1932_v18  ;;  %v100_v13 = vpop.xlane.xlu0 %99  ;;  %v97_v14 = vpop.xlane.xlu1 %96 }
  0x99   :  { %1627 = vmatpush3.msra.mxu0 %v131_v11  ;;  %v129_v15 = vmul.f32 0.015625, %v100_v13  ;;  %v128_v16 = vmul.f32 0.015625, %v97_v14  ;;  %v2232_v11 = vld [vmem:[%s2878_s2 + $0x30] sm:$0xff] }
  0x9a   :  { %1628 = vmatprep.subr.mxu0 %v1932_v18 }
  0x9b   :  { %1629 = vmatpush3.msra.mxu0 %v130_v12 }
  0x9c   :  { %1630 = vmatprep.subr.mxu0 %v1932_v18  ;;  %v94_v17 = vpop.xlane.xlu0 %93  ;;  %v91_v19 = vpop.xlane.xlu1 %90 }
  0x9d   :  { %1631 = vmatpush3.msra.mxu0 %v129_v15  ;;  %v127_v20 = vmul.f32 0.015625, %v94_v17  ;;  %v126_v21 = vmul.f32 0.015625, %v91_v19  ;;  %v2242_v15 = vld [vmem:[%s2878_s2 + $0x38] sm:$0xff] }
  0x9e   :  { %1632 = vmatprep.subr.mxu0 %v1932_v18 }
  0x9f   :  { %1633 = vmatpush3.msra.mxu0 %v128_v16  ;;  %v2248_v16 = vld [vmem:[%s2878_s2 + $0x40] sm:$0xff] }
  0xa0   :  { %1634 = vmatprep.subr.mxu0 %v1932_v18  ;;  %v88_v22 = vpop.xlane.xlu0 %87  ;;  %v85_v23 = vpop.xlane.xlu1 %84 }
  0xa1   :  { %1635 = vmatpush3.msra.mxu0 %v127_v20  ;;  %v125_v24 = vmul.f32 0.015625, %v88_v22  ;;  %v124_v25 = vmul.f32 0.015625, %v85_v23  ;;  %v2258_v22 = vld [vmem:[%s2878_s2 + $0x48] sm:$0xff]  ;;  %v2264_v23 = vld [vmem:[%s2878_s2 + $0x50] sm:$0xff] }
  0xa2   :  { %1636 = vmatprep.subr.mxu0 %v1932_v18 }
  0xa3   :  { %1637 = vmatpush3.msra.mxu0 %v126_v21 }
  0xa4   :  { %1638 = vmatprep.subr.mxu0 %v1932_v18  ;;  %v82_v26 = vpop.xlane.xlu0 %81  ;;  %v79_v27 = vpop.xlane.xlu1 %78 }
  0xa5   :  { %1639 = vmatpush3.msra.mxu0 %v125_v24  ;;  %v123_v28 = vmul.f32 0.015625, %v82_v26  ;;  %v122_v29 = vmul.f32 0.015625, %v79_v27  ;;  %v2274_v27 = vld [vmem:[%s2878_s2 + $0x58] sm:$0xff] }
  0xa6   :  { %1640 = vmatprep.subr.mxu0 %v1932_v18 }
  0xa7   :  { %1641 = vmatpush3.msra.mxu0 %v124_v25 }
  0xa8   :  { %1642 = vmatprep.subr.mxu0 %v1932_v18  ;;  %v76_v30 = vpop.xlane.xlu0 %75  ;;  %v73_v31 = vpop.xlane.xlu1 %72 }
  0xa9   :  { %1643 = vmatpush3.msra.mxu0 %v123_v28  ;;  %v121_v32 = vmul.f32 0.015625, %v76_v30  ;;  %v120_v33 = vmul.f32 0.015625, %v73_v31  ;;  %v2280_v28 = vld [vmem:[%s2878_s2 + $0x60] sm:$0xff] }
  0xaa   :  { %1644 = vmatprep.subr.mxu0 %v1932_v18 }
  0xab   :  { %1645 = vmatpush3.msra.mxu0 %v122_v29 }
  0xac   :  { %1646 = vmatprep.subr.mxu0 %v1932_v18  ;;  %v760_v52 = vpop.xlane.xlu0 %759  ;;  %v757_v53 = vpop.xlane.xlu1 %756 }
  0xad   :  { %1647 = vmatpush3.msra.mxu0 %v121_v32  ;;  %v776_v62 = vmul.f32 0.015625, %v760_v52  ;;  %v775_v2 = vmul.f32 0.015625, %v757_v53  ;;  %v2290_v32 = vld [vmem:[%s2878_s2 + $0x68] sm:$0xff] }
  0xae   :  { %1648 = vmatprep.subr.mxu0 %v1932_v18 }
  0xaf   :  { %1649 = vmatpush3.msra.mxu0 %v120_v33 }
  0xb0   :  { %1651 = vmatmul.mubr.f32.vlgmr.msra.gmra.mxu0 %v2115_v34  ;;  %v754_v54 = vpop.xlane.xlu0 %753  ;;  %v751_v55 = vpop.xlane.xlu1 %750 }
  0xb1   :  { %1716 = vmatprep.mubr.msk.f32.mxu0 %vm271_vm2, %v21_v35  ;;  %v774_v4 = vmul.f32 0.015625, %v754_v54  ;;  %v773_v7 = vmul.f32 0.015625, %v751_v55  ;;  %v2296_v35 = vld [vmem:[%s2878_s2 + $0x70] sm:$0xff] }
  0xb4   :  { %v748_v56 = vpop.xlane.xlu0 %747  ;;  %v745_v59 = vpop.xlane.xlu1 %744 }
  0xb5   :  { %v772_v9 = vmul.f32 0.015625, %v748_v56  ;;  %v771_v13 = vmul.f32 0.015625, %v745_v59 }
  0xb8   :  { %v742_v1 = vpop.xlane.xlu0 %741  ;;  %v739_v3 = vpop.xlane.xlu1 %738 }
  0xb9   :  { %v770_v14 = vmul.f32 0.015625, %v742_v1  ;;  %v769_v19 = vmul.f32 0.015625, %v739_v3 }
  0xbc   :  { %v736_v8 = vpop.xlane.xlu0 %735  ;;  %v733_v12 = vpop.xlane.xlu1 %732 }
  0xbd   :  { %v768_v21 = vmul.f32 0.015625, %v736_v8  ;;  %v767_v24 = vmul.f32 0.015625, %v733_v12 }
  0xc0   :  { %v730_v17 = vpop.xlane.xlu0 %729  ;;  %v727_v20 = vpop.xlane.xlu1 %726 }
  0xc1   :  { %v766_v26 = vmul.f32 0.015625, %v730_v17  ;;  %v765_v30 = vmul.f32 0.015625, %v727_v20 }
  0xc4   :  { %v724_v25 = vpop.xlane.xlu0 %723  ;;  %v721_v29 = vpop.xlane.xlu1 %720 }
  0xc5   :  { %v764_v31 = vmul.f32 0.015625, %v724_v25  ;;  %v763_v37 = vmul.f32 0.015625, %v721_v29 }
  0xc8   :  { %v718_v33 = vpop.xlane.xlu0 %717  ;;  %v715_v38 = vpop.xlane.xlu1 %714 }
  0xc9   :  { %v762_v39 = vmul.f32 0.015625, %v718_v33  ;;  %v761_v41 = vmul.f32 0.015625, %v715_v38 }
  0xcc   :  { %v2319_v43 = vpop.permute.xlu1 %225  ;;  %v2325_v47 = vpop.permute.xlu0 %223 }
  0xd0   :  { %v2321_v44 = vpop.permute.xlu1 %227  ;;  %v2332_v55 = vpop.permute.xlu0 %231 }
  0xd4   :  { %v2323_v45 = vpop.permute.xlu1 %229 }
  0xd8   :  { %v2329_v52 = vpop.permute.xlu1 %233 }
  0xdc   :  { %v2336_v1 = vpop.permute.xlu1 %237 }
 0x170   :  { %v202_v57 = vpop.f32.mrf.mxu0 }
 0x171   :  { %v203_v58 = vadd.f32 %v202_v57, %v2127_v36 }
 0x172   :  { %v1652_v60 = vpop.f32.mrf.mxu0 }
 0x173   :  { %v206_v61 = vmax.f32 %v203_v58, 0.0 }
 0x175   :  { %1653 = vmatprep.subr.mxu1 %v206_v61 }
 0x176   :  { %1654 = vmatpush3.msra.mxu1 %v206_v61 }
 0x177   :  { %1656 = vmatmul.mubr.msk.f32.vlgmr.msra.gmra.mxu1 %vm271_vm2, %v2195_v63  ;;  %1679 = vmatprep.subr.mxu1 %v1932_v18 }
 0x178   :  { %1680 = vmatpush3.msra.mxu1 %v776_v62  ;;  %1658 = vmatprep.mubr.msk.f32.mxu1 %vm271_vm2, %v2200_v0 }
 0x179   :  { %1681 = vmatprep.subr.mxu1 %v1932_v18 }
 0x17a   :  { %1682 = vmatpush3.msra.mxu1 %v775_v2 }
 0x17b   :  { %1659 = vmatmul.mubr.msk.f32.gmra.mxu1 %vm271_vm2, %v2210_v5  ;;  %1683 = vmatprep.subr.mxu1 %v1932_v18 }
 0x17c   :  { %1684 = vmatpush3.msra.mxu1 %v774_v4  ;;  %1661 = vmatprep.mubr.msk.f32.mxu1 %vm271_vm2, %v2216_v6  ;;  %v2339_v4 = vpop.permute.xlu0 %235 }
 0x17d   :  { %1685 = vmatprep.subr.mxu1 %v1932_v18 }
 0x17e   :  { %1686 = vmatpush3.msra.mxu1 %v773_v7 }
 0x17f   :  { %1662 = vmatmul.mubr.msk.f32.gmra.mxu1 %vm271_vm2, %v2226_v10  ;;  %1687 = vmatprep.subr.mxu1 %v1932_v18 }
 0x180   :  { %1688 = vmatpush3.msra.mxu1 %v772_v9  ;;  %1664 = vmatprep.mubr.msk.f32.mxu1 %vm271_vm2, %v2232_v11 }
 0x181   :  { %1689 = vmatprep.subr.mxu1 %v1932_v18 }
 0x182   :  { %1690 = vmatpush3.msra.mxu1 %v771_v13 }
 0x183   :  { %1665 = vmatmul.mubr.msk.f32.gmra.mxu1 %vm271_vm2, %v2242_v15  ;;  %1691 = vmatprep.subr.mxu1 %v1932_v18 }
 0x184   :  { %1692 = vmatpush3.msra.mxu1 %v770_v14  ;;  %1667 = vmatprep.mubr.msk.f32.mxu1 %vm271_vm2, %v2248_v16 }
 0x185   :  { %1693 = vmatprep.subr.mxu1 %v1932_v18 }
 0x186   :  { %1694 = vmatpush3.msra.mxu1 %v769_v19  ;;  %v2345_v19 = vpop.permute.xlu0 %239 }
 0x187   :  { %1668 = vmatmul.mubr.msk.f32.gmra.mxu1 %vm271_vm2, %v2258_v22  ;;  %1695 = vmatprep.subr.mxu1 %v1932_v18 }
 0x188   :  { %1696 = vmatpush3.msra.mxu1 %v768_v21  ;;  %1670 = vmatprep.mubr.msk.f32.mxu1 %vm271_vm2, %v2264_v23 }
 0x189   :  { %1697 = vmatprep.subr.mxu1 %v1932_v18 }
 0x18a   :  { %1698 = vmatpush3.msra.mxu1 %v767_v24 }
 0x18b   :  { %1671 = vmatmul.mubr.msk.f32.gmra.mxu1 %vm271_vm2, %v2274_v27  ;;  %1699 = vmatprep.subr.mxu1 %v1932_v18 }
 0x18c   :  { %1700 = vmatpush3.msra.mxu1 %v766_v26  ;;  %1673 = vmatprep.mubr.msk.f32.mxu1 %vm271_vm2, %v2280_v28 }
 0x18d   :  { %1701 = vmatprep.subr.mxu1 %v1932_v18 }
 0x18e   :  { %1702 = vmatpush3.msra.mxu1 %v765_v30 }
 0x18f   :  { %1674 = vmatmul.mubr.msk.f32.gmra.mxu1 %vm271_vm2, %v2290_v32  ;;  %1703 = vmatprep.subr.mxu1 %v1932_v18 }
 0x190   :  { %1704 = vmatpush3.msra.mxu1 %v764_v31  ;;  %1676 = vmatprep.mubr.msk.f32.mxu1 %vm271_vm2, %v2296_v35 }
 0x191   :  { %1705 = vmatprep.subr.mxu1 %v1932_v18 }
 0x192   :  { %1706 = vmatpush3.msra.mxu1 %v763_v37 }
 0x193   :  { %1677 = vmatmul.mubr.msk.f32.gmra.mxu1 %vm271_vm2, %v2306_v40  ;;  %1707 = vmatprep.subr.mxu1 %v1932_v18 }
 0x194   :  { %1708 = vmatpush3.msra.mxu1 %v762_v39  ;;  %1711 = vmatprep.mubr.msk.f32.mxu1 %vm1933_vm1, %v1932_v18 }
 0x195   :  { %1709 = vmatprep.subr.mxu1 %v1932_v18 }
 0x196   :  { %1710 = vmatpush3.msra.mxu1 %v761_v41 }
 0x197   :  { %1712 = vmatmul.mubr.f32.vlgmr.msra.gmra.mxu1 %v2115_v34  ;;  %1740 = vmatprep.subr.mxu1 %v1932_v18 }
 0x198   :  { %1756 = vmatprep.mubr.msk.f32.mxu1 %vm1933_vm1, %v1932_v18 }
 0x237   :  { %v1657_v46 = vpop.f32.mrf.mxu1 }
 0x238   :  { %v392_v48 = vadd.f32 %v1657_v46, %v2319_v43 }
 0x239   :  { %v386_v34 = vpop.f32.mrf.mxu1 }
 0x23a   :  { %v1444_v49 = vmul.f32 -1.442695, %v392_v48  ;;  %v387_v50 = vadd.f32 %v386_v34, %v2325_v47 }
 0x23b   :  { %v1660_v51 = vpop.f32.mrf.mxu1 }
 0x23c   :  { %1768 = vpow2.f32 %v1444_v49  ;;  %v1443_v53 = vmul.f32 -1.442695, %v387_v50  ;;  %v402_v54 = vadd.f32 %v1660_v51, %v2323_v45 }
 0x23d   :  { %v396_v56 = vpop.f32.mrf.mxu1 }
 0x23e   :  { %1770 = vpow2.f32 %v1443_v53  ;;  %v1446_v57 = vmul.f32 -1.442695, %v402_v54  ;;  %v397_v58 = vadd.f32 %v396_v56, %v2321_v44 }
 0x23f   :  { %v1663_v59 = vpop.f32.mrf.mxu1 }
 0x240   :  { %1772 = vpow2.f32 %v1446_v57  ;;  %v1445_v60 = vmul.f32 -1.442695, %v397_v58  ;;  %v412_v61 = vadd.f32 %v1663_v59, %v2329_v52 }
 0x241   :  { %v406_v62 = vpop.f32.mrf.mxu1 }
 0x242   :  { %1774 = vpow2.f32 %v1445_v60  ;;  %v1448_v2 = vmul.f32 -1.442695, %v412_v61  ;;  %v407_v3 = vadd.f32 %v406_v62, %v2332_v55 }
 0x243   :  { %v1666_v7 = vpop.f32.mrf.mxu1 }
 0x244   :  { %1776 = vpow2.f32 %v1448_v2  ;;  %v1447_v8 = vmul.f32 -1.442695, %v407_v3  ;;  %v422_v9 = vadd.f32 %v1666_v7, %v2336_v1 }
 0x245   :  { %v416_v12 = vpop.f32.mrf.mxu1 }
 0x246   :  { %v1450_v13 = vmul.f32 -1.442695, %v422_v9  ;;  %v417_v14 = vadd.f32 %v416_v12, %v2339_v4  ;;  %1778 = vpow2.f32 %v1447_v8 }
 0x247   :  { %v2343_v17 = vpop.f32.mrf.mxu1 }
 0x248   :  { %1780 = vpow2.f32 %v1450_v13  ;;  %v1449_v26 = vmul.f32 -1.442695, %v417_v14 }
 0x249   :  { %v1769_v20 = vpop.eup %1768  ;;  %v426_v21 = vpop.f32.mrf.mxu1 }
 0x24a   :  { %v514_v24 = vadd.f32 1.0, %v1769_v20  ;;  %v427_v29 = vadd.f32 %v426_v21, %v2345_v19 }
 0x24b   :  { %v1771_v25 = vpop.eup %1770  ;;  %v2348_v30 = vpop.f32.mrf.mxu1 }
 0x24c   :  { %1782 = vrcp.f32 %v514_v24  ;;  %v513_v31 = vadd.f32 1.0, %v1771_v25  ;;  %v1451_v41 = vmul.f32 -1.442695, %v427_v29 }
 0x24d   :  { %v1773_v33 = vpop.eup %1772  ;;  %v2350_v37 = vpop.f32.mrf.mxu1 }
 0x24e   :  { %1784 = vrcp.f32 %v513_v31  ;;  %v516_v38 = vadd.f32 1.0, %v1773_v33 }
 0x24f   :  { %v1775_v39 = vpop.eup %1774  ;;  %1786 = vpow2.f32 %v1449_v26  ;;  %v2352_v42 = vpop.f32.mrf.mxu1 }
 0x250   :  { %1788 = vrcp.f32 %v516_v38  ;;  %v515_v46 = vadd.f32 1.0, %v1775_v39 }
 0x251   :  { %v1777_v48 = vpop.eup %1776  ;;  %v2354_v34 = vpop.f32.mrf.mxu1  ;;  %1790 = vpow2.f32 %v1451_v41 }
 0x252   :  { %1792 = vrcp.f32 %v515_v46  ;;  %v518_v50 = vadd.f32 1.0, %v1777_v48 }
 0x253   :  { %v2356_v49 = vpop.f32.mrf.mxu1  ;;  %v1779_v51 = vpop.eup %1778 }
 0x254   :  { %1794 = vrcp.f32 %v518_v50  ;;  %v517_v57 = vadd.f32 1.0, %v1779_v51 }
 0x255   :  { %v2358_v53 = vpop.f32.mrf.mxu1  ;;  %v1781_v56 = vpop.eup %1780 }
 0x256   :  { %1796 = vrcp.f32 %v517_v57  ;;  %v520_v3 = vadd.f32 1.0, %v1781_v56 }
 0x257   :  { %v843_v54 = vpop.f32.mrf.mxu1 }
 0x258   :  { %v844_v58 = vadd.f32 %v843_v54, %v2127_v36  ;;  %1798 = vrcp.f32 %v520_v3 }
 0x259   :  { %v1783_v59 = vpop.eup %1782  ;;  %v1713_v60 = vpop.f32.mrf.mxu1 }
 0x25a   :  { %v847_v61 = vmax.f32 %v844_v58, 0.0  ;;  %568 = vperm.xlu1 %1766, %v1783_v59  }
 0x25b   :  { %v1785_v62 = vpop.eup %1784 }
 0x25c   :  { %v1787_v2 = vpop.eup %1786  ;;  %563 = vperm.xlu0 %1767, %v1785_v62   ;;  %1714 = vmatprep.subr.mxu0 %v847_v61 }
 0x25d   :  { %v1789_v7 = vpop.eup %1788  ;;  %1715 = vmatpush3.msra.mxu0 %v847_v61  ;;  %v519_v8 = vadd.f32 1.0, %v1787_v2 }
 0x25e   :  { %1717 = vmatmul.mubr.msk.f32.vlgmr.msra.gmra.mxu0 %vm271_vm2, %v2195_v63  ;;  %578 = vperm.xlu1 %1766, %v1789_v7   ;;  %v1791_v36 = vpop.eup %1790 }
 0x25f   :  { %1719 = vmatprep.mubr.msk.f32.mxu0 %vm271_vm2, %v2200_v0  ;;  %v1793_v9 = vpop.eup %1792  ;;  %1800 = vrcp.f32 %v519_v8  ;;  %v521_v12 = vadd.f32 1.0, %v1791_v36 }
 0x261   :  { %v1795_v13 = vpop.eup %1794  ;;  %1802 = vrcp.f32 %v521_v12 }
 0x262   :  { %1720 = vmatmul.mubr.msk.f32.gmra.mxu0 %vm271_vm2, %v2210_v5  ;;  %573 = vperm.xlu1 %1766, %v1793_v9  }
 0x263   :  { %1722 = vmatprep.mubr.msk.f32.mxu0 %vm271_vm2, %v2216_v6  ;;  %v1797_v63 = vpop.eup %1796 }
 0x265   :  { %v1799_v0 = vpop.eup %1798 }
 0x266   :  { %588 = vperm.xlu1 %1766, %v1795_v13   ;;  %1723 = vmatmul.mubr.msk.f32.gmra.mxu0 %vm271_vm2, %v2226_v10  ;;  %v242_v10 = vpop.permute.xlu1 %241 }
 0x267   :  { %1725 = vmatprep.mubr.msk.f32.mxu0 %vm271_vm2, %v2232_v11  ;;  %v432_v11 = vadd.f32 %v2343_v17, %v242_v10 }
 0x26a   :  { %583 = vperm.xlu1 %1766, %v1797_v63   ;;  %1726 = vmatmul.mubr.msk.f32.gmra.mxu0 %vm271_vm2, %v2242_v15  ;;  %v2392_v15 = vpop.permute.xlu0 %243 }
 0x26b   :  { %1728 = vmatprep.mubr.msk.f32.mxu0 %vm271_vm2, %v2248_v16 }
 0x26c   :  { %v1801_v5 = vpop.eup %1800 }
 0x26e   :  { %598 = vperm.xlu1 %1766, %v1799_v0   ;;  %1729 = vmatmul.mubr.msk.f32.gmra.mxu0 %vm271_vm2, %v2258_v22  ;;  %v1803_v6 = vpop.eup %1802  ;;  %v2394_v22 = vpop.permute.xlu1 %245 }
 0x26f   :  { %1731 = vmatprep.mubr.msk.f32.mxu0 %vm271_vm2, %v2264_v23  ;;  %v442_v24 = vadd.f32 %v2348_v30, %v2394_v22 }
 0x271   :  { %v1454_v38 = vmul.f32 -1.442695, %v442_v24 }
 0x272   :  { %593 = vperm.xlu1 %1766, %v1801_v5   ;;  %1732 = vmatmul.mubr.msk.f32.gmra.mxu0 %vm271_vm2, %v2274_v27  ;;  %v1452_v27 = vmul.f32 -1.442695, %v432_v11  ;;  %v2405_v26 = vpop.permute.xlu1 %249 }
 0x273   :  { %1734 = vmatprep.mubr.msk.f32.mxu0 %vm271_vm2, %v2280_v28  ;;  %v437_v28 = vadd.f32 %v2350_v37, %v2392_v15 }
 0x276   :  { %603 = vperm.xlu1 %1766, %v1803_v6   ;;  %1735 = vmatmul.mubr.msk.f32.gmra.mxu0 %vm271_vm2, %v2290_v32  ;;  %v2420_v61 = vpop.permute.xlu1 %253 }
 0x277   :  { %1737 = vmatprep.mubr.msk.f32.mxu0 %vm271_vm2, %v2296_v35 }
 0x27a   :  { %1738 = vmatmul.mubr.msk.f32.gmra.mxu0 %vm271_vm2, %v2306_v40  ;;  %v2400_v40 = vpop.permute.xlu0 %247 }
 0x27b   :  { %v447_v30 = vadd.f32 %v2354_v34, %v2400_v40 }
 0x27d   :  { %v1455_v56 = vmul.f32 -1.442695, %v447_v30 }
 0x27e   :  { %v2413_v41 = vpop.permute.xlu0 %251 }
 0x31e   :  { %v1718_v16 = vpop.f32.mrf.mxu0 }
 0x31f   :  { %v920_v23 = vadd.f32 %v1718_v16, %v2319_v43  ;;  %v1453_v43 = vmul.f32 -1.442695, %v437_v28 }
 0x320   :  { %v914_v32 = vpop.f32.mrf.mxu0 }
 0x321   :  { %v1492_v14 = vmul.f32 -1.442695, %v920_v23  ;;  %v915_v35 = vadd.f32 %v914_v32, %v2325_v47 }
 0x322   :  { %v1721_v20 = vpop.f32.mrf.mxu0 }
 0x323   :  { %1804 = vpow2.f32 %v1492_v14  ;;  %v1491_v17 = vmul.f32 -1.442695, %v915_v35  ;;  %v930_v21 = vadd.f32 %v1721_v20, %v2323_v45  ;;  %v452_v45 = vadd.f32 %v2352_v42, %v2405_v26 }
 0x324   :  { %1806 = vpow2.f32 %v1452_v27  ;;  %v924_v25 = vpop.f32.mrf.mxu0  ;;  %v457_v42 = vadd.f32 %v2358_v53, %v2413_v41 }
 0x325   :  { %1808 = vpow2.f32 %v1491_v17  ;;  %v1494_v29 = vmul.f32 -1.442695, %v930_v21  ;;  %v925_v31 = vadd.f32 %v924_v25, %v2321_v44  ;;  %v1456_v51 = vmul.f32 -1.442695, %v452_v45 }
 0x326   :  { %v1724_v47 = vpop.f32.mrf.mxu0 }
 0x327   :  { %1810 = vpow2.f32 %v1494_v29  ;;  %v1493_v33 = vmul.f32 -1.442695, %v925_v31  ;;  %v940_v37 = vadd.f32 %v1724_v47, %v2329_v52 }
 0x328   :  { %1812 = vpow2.f32 %v1453_v43  ;;  %v934_v39 = vpop.f32.mrf.mxu0 }
 0x329   :  { %1814 = vpow2.f32 %v1493_v33  ;;  %v1496_v46 = vmul.f32 -1.442695, %v940_v37  ;;  %v935_v44 = vadd.f32 %v934_v39, %v2332_v55  ;;  %v1457_v55 = vmul.f32 -1.442695, %v457_v42 }
 0x32a   :  { %v1727_v48 = vpop.f32.mrf.mxu0 }
 0x32b   :  { %1816 = vpow2.f32 %v1496_v46  ;;  %v1495_v50 = vmul.f32 -1.442695, %v935_v44  ;;  %v950_v52 = vadd.f32 %v1727_v48, %v2336_v1 }
 0x32c   :  { %1818 = vpow2.f32 %v1454_v38  ;;  %v944_v54 = vpop.f32.mrf.mxu0 }
 0x32d   :  { %v1498_v57 = vmul.f32 -1.442695, %v950_v52  ;;  %v945_v34 = vadd.f32 %v944_v54, %v2339_v4  ;;  %1820 = vpow2.f32 %v1495_v50  ;;  %v462_v4 = vadd.f32 %v2356_v49, %v2420_v61 }
 0x32e   :  { %v1730_v58 = vpop.f32.mrf.mxu0  ;;  %1822 = vpow2.f32 %v1456_v51 }
 0x32f   :  { %1824 = vpow2.f32 %v1455_v56  ;;  %v960_v62 = vadd.f32 %v1730_v58, %v242_v10  ;;  %v1497_v3 = vmul.f32 -1.442695, %v945_v34  ;;  %v1458_v11 = vmul.f32 -1.442695, %v462_v4 }
 0x330   :  { %v1805_v59 = vpop.eup %1804  ;;  %1826 = vpow2.f32 %v1498_v57  ;;  %v954_v7 = vpop.f32.mrf.mxu0 }
 0x331   :  { %v1807_v60 = vpop.eup %1806  ;;  %v1042_v1 = vadd.f32 1.0, %v1805_v59  ;;  %v1500_v13 = vmul.f32 -1.442695, %v960_v62  ;;  %v955_v0 = vadd.f32 %v954_v7, %v2345_v19 }
 0x332   :  { %v1809_v2 = vpop.eup %1808  ;;  %v522_v8 = vadd.f32 1.0, %v1807_v60  ;;  %v1733_v6 = vpop.f32.mrf.mxu0 }
 0x333   :  { %1828 = vrcp.f32 %v1042_v1  ;;  %v1041_v53 = vadd.f32 1.0, %v1809_v2  ;;  %v970_v49 = vadd.f32 %v1733_v6, %v2394_v22  ;;  %v1499_v27 = vmul.f32 -1.442695, %v955_v0 }
 0x334   :  { %v1811_v36 = vpop.eup %1810  ;;  %1830 = vpow2.f32 %v1457_v55  ;;  %v964_v32 = vpop.f32.mrf.mxu0 }
 0x335   :  { %v1813_v9 = vpop.eup %1812  ;;  %1832 = vrcp.f32 %v1041_v53  ;;  %v1044_v12 = vadd.f32 1.0, %v1811_v36  ;;  %v1502_v19 = vmul.f32 -1.442695, %v970_v49  ;;  %v965_v24 = vadd.f32 %v964_v32, %v2392_v15 }
 0x336   :  { %v1815_v63 = vpop.eup %1814  ;;  %1834 = vpow2.f32 %v1497_v3  ;;  %v523_v23 = vadd.f32 1.0, %v1813_v9  ;;  %v1736_v17 = vpop.f32.mrf.mxu0 }
 0x337   :  { %1836 = vrcp.f32 %v1044_v12  ;;  %v1043_v5 = vadd.f32 1.0, %v1815_v63  ;;  %v980_v47 = vadd.f32 %v1736_v17, %v2405_v26  ;;  %v1501_v38 = vmul.f32 -1.442695, %v965_v24  ;;  %v1232_v24 = vld [vmem:[%s2880_s4 + $0x38] sm:$0xff] }
 0x338   :  { %v1817_v10 = vpop.eup %1816  ;;  %1838 = vrcp.f32 %v522_v8  ;;  %v974_v33 = vpop.f32.mrf.mxu0  ;;  %1741 = vmatpush3.msra.mxu1 %v1232_v24  ;;  %v1910_v24 = vld [vmem:[%s2876_s0 + $0x98] sm:$0xff] }
 0x339   :  { %v1819_v16 = vpop.eup %1818  ;;  %1840 = vpow2.f32 %v1500_v13  ;;  %v1046_v28 = vadd.f32 1.0, %v1817_v10  ;;  %v1504_v48 = vmul.f32 -1.442695, %v980_v47  ;;  %v975_v26 = vadd.f32 %v974_v33, %v2400_v40  ;;  %1742 = vmatprep.subr.mxu1 %v1932_v18  ;;  %v1226_v47 = vld [vmem:[%s2880_s4 + $0x8] sm:$0xff]  ;;  %v1225_v33 = vld [vmem:[%s2880_s4] sm:$0xff] }
 0x33a   :  { %1842 = vrcp.f32 %v1043_v5  ;;  %v1821_v14 = vpop.eup %1820  ;;  %v524_v35 = vadd.f32 1.0, %v1819_v16  ;;  %v1739_v30 = vpop.f32.mrf.mxu0 }
 0x33b   :  { %1844 = vpow2.f32 %v1458_v11  ;;  %v1823_v20 = vpop.eup %1822  ;;  %v1045_v25 = vadd.f32 1.0, %v1821_v14  ;;  %v1503_v55 = vmul.f32 -1.442695, %v975_v26  ;;  %v990_v53 = vadd.f32 %v1739_v30, %v2420_v61 }
 0x33c   :  { %1846 = vrcp.f32 %v523_v23  ;;  %v1825_v21 = vpop.eup %1824  ;;  %v526_v46 = vadd.f32 1.0, %v1823_v20  ;;  %v984_v51 = vpop.f32.mrf.mxu0 }
 0x33d   :  { %1848 = vpow2.f32 %v1499_v27  ;;  %v1827_v43 = vpop.eup %1826  ;;  %v525_v31 = vadd.f32 1.0, %v1825_v21  ;;  %v985_v58 = vadd.f32 %v984_v51, %v2413_v41  ;;  %v1506_v4 = vmul.f32 -1.442695, %v990_v53  ;;  %v1904_v53 = vld [vmem:[%s2876_s0 + $0x20] sm:$0xff] }
 0x33e   :  { %1850 = vrcp.f32 %v1046_v28  ;;  %v1048_v39 = vadd.f32 1.0, %v1827_v43  ;;  %v1231_v43 = vld [vmem:[%s2880_s4 + $0x30] sm:$0xff] }
 0x33f   :  { %1852 = vrcp.f32 %v524_v35  ;;  %v1505_v2 = vmul.f32 -1.442695, %v985_v58  ;;  %1743 = vmatpush3.msra.mxu1 %v1231_v43 }
 0x340   :  { %v1829_v29 = vpop.eup %1828  ;;  %1854 = vpow2.f32 %v1502_v19  ;;  %1744 = vmatprep.subr.mxu1 %v1932_v18 }
 0x341   :  { %v1831_v22 = vpop.eup %1830  ;;  %1096 = vperm.xlu0 %1767, %v1829_v29   ;;  %1856 = vrcp.f32 %v1045_v25  ;;  %v1230_v25 = vld [vmem:[%s2880_s4 + $0x28] sm:$0xff]  ;;  %v1229_v29 = vld [vmem:[%s2880_s4 + $0x20] sm:$0xff] }
 0x342   :  { %v1833_v37 = vpop.eup %1832  ;;  %1858 = vrcp.f32 %v525_v31  ;;  %v527_v54 = vadd.f32 1.0, %v1831_v22  ;;  %1745 = vmatpush3.msra.mxu1 %v1230_v25  ;;  %v1228_v22 = vld [vmem:[%s2880_s4 + $0x18] sm:$0xff]  ;;  %v1227_v31 = vld [vmem:[%s2880_s4 + $0x10] sm:$0xff]  ;;  %v1911_v25 = vld [vmem:[%s2876_s0 + $0xa0] sm:$0xff] }
 0x343   :  { %v1835_v45 = vpop.eup %1834  ;;  %1091 = vperm.xlu1 %1766, %v1833_v37   ;;  %1860 = vpow2.f32 %v1501_v38  ;;  %1746 = vmatprep.subr.mxu1 %v1932_v18  ;;  %v53_v37 = vld [vmem:[%s2879_s3] sm:$0x1]  ;;  %v569_v38 = vpop.permute.xlu1 %568 }
 0x344   :  { %v1837_v15 = vpop.eup %1836  ;;  %1862 = vrcp.f32 %v1048_v39  ;;  %v1047_v52 = vadd.f32 1.0, %v1835_v45  ;;  %1747 = vmatpush3.msra.mxu1 %v1229_v29 }
 0x345   :  { %v1839_v44 = vpop.eup %1838  ;;  %1106 = vperm.xlu0 %1767, %v1837_v15   ;;  %1864 = vrcp.f32 %v526_v46  ;;  %1748 = vmatprep.subr.mxu1 %v1932_v18 }
 0x346   :  { %v1841_v50 = vpop.eup %1840  ;;  %1866 = vpow2.f32 %v1504_v48  ;;  %1749 = vmatpush3.msra.mxu1 %v1228_v22  ;;  %v564_v48 = vpop.permute.xlu0 %563 }
 0x347   :  { %608 = vperm.xlu1 %1766, %v1839_v44   ;;  %v1843_v42 = vpop.eup %1842  ;;  %v1050_v57 = vadd.f32 1.0, %v1841_v50  ;;  %1868 = vrcp.f32 %v1047_v52  ;;  %1750 = vmatprep.subr.mxu1 %v1932_v18  ;;  %v579_v45 = vpop.permute.xlu1 %578 }
 0x348   :  { %v1845_v56 = vpop.eup %1844  ;;  %1870 = vrcp.f32 %v527_v54  ;;  %1751 = vmatpush3.msra.mxu1 %v1227_v31  ;;  %v1901_v54 = vld [vmem:[%s2876_s0 + $0x8] sm:$0xff] }
 0x349   :  { %1101 = vperm.xlu0 %1767, %v1843_v42   ;;  %v1847_v34 = vpop.eup %1846  ;;  %v528_v62 = vadd.f32 1.0, %v1845_v56  ;;  %1872 = vrcp.f32 %v1050_v57  ;;  %1752 = vmatprep.subr.mxu1 %v1932_v18  ;;  %v2473_v56 = vmul.f32 %v1901_v54, %v569_v38  ;;  %v1902_v57 = vld [vmem:[%s2876_s0 + $0x10] sm:$0xff] }
 0x34a   :  { %v1849_v59 = vpop.eup %1848  ;;  %1874 = vpow2.f32 %v1503_v55  ;;  %1753 = vmatpush3.msra.mxu1 %v1226_v47  ;;  %v1912_v47 = vld [vmem:[%s2876_s0 + $0x38] sm:$0xff] }
 0x34b   :  { %613 = vperm.xlu1 %1766, %v1847_v34   ;;  %v1851_v60 = vpop.eup %1850  ;;  %v1049_v3 = vadd.f32 1.0, %v1849_v59  ;;  %1876 = vrcp.f32 %v528_v62  ;;  %1754 = vmatprep.subr.mxu1 %v1932_v18  ;;  %v574_v39 = vpop.permute.xlu1 %573  ;;  %v1900_v18 = vld [vmem:[%s2876_s0] sm:$0xff] }
 0x34c   :  { %v1853_v1 = vpop.eup %1852  ;;  %1878 = vpow2.f32 %v1505_v2  ;;  %1755 = vmatpush3.msra.mxu1 %v1225_v33  ;;  %v2468_v51 = vmul.f32 %v1900_v18, %v564_v48  ;;  %v2478_v34 = vmul.f32 %v1902_v57, %v574_v39  ;;  %v1903_v2 = vld [vmem:[%s2876_s0 + $0x18] sm:$0xff]  ;;  %v1913_v39 = vld [vmem:[%s2876_s0 + $0x40] sm:$0xff] }
 0x34d   :  { %1116 = vperm.xlu0 %1767, %v1851_v60   ;;  %v1855_v40 = vpop.eup %1854  ;;  %1880 = vrcp.f32 %v1049_v3  ;;  %v658_v60 = vsel %vm70_vm0, %v2473_v56, 0.0  ;;  %v2489_v3 = vmul.f32 %v1903_v2, %v579_v45 }
 0x34e   :  { %v1857_v7 = vpop.eup %1856  ;;  %v1052_v41 = vadd.f32 1.0, %v1855_v40  ;;  %v657_v59 = vsel %vm70_vm0, %v2468_v51, 0.0 }
 0x34f   :  { %618 = vperm.xlu1 %1766, %v1853_v1   ;;  %v1859_v36 = vpop.eup %1858  ;;  %v589_v30 = vpop.permute.xlu1 %588  ;;  %v660_v1 = vsel %vm70_vm0, %v2478_v34, 0.0  ;;  %v659_v62 = vadd.f32 %v658_v60, %v657_v59  ;;  %v1917_v60 = vld [vmem:[%s2876_s0 + $0x50] sm:$0xff] }
 0x350   :  { %v1861_v8 = vpop.eup %1860  ;;  %1882 = vrcp.f32 %v1052_v41 }
 0x351   :  { %1111 = vperm.xlu0 %1767, %v1857_v7   ;;  %v1863_v9 = vpop.eup %1862  ;;  %v1051_v63 = vadd.f32 1.0, %v1861_v8  ;;  %1884 = vpow2.f32 %v1506_v4  ;;  %v661_v41 = vadd.f32 %v660_v1, %v659_v62  ;;  %v1905_v8 = vld [vmem:[%s2876_s0 + $0x80] sm:$0xff] }
 0x352   :  { %v1865_v12 = vpop.eup %1864 }
 0x353   :  { %623 = vperm.xlu1 %1766, %v1859_v36   ;;  %v1867_v13 = vpop.eup %1866  ;;  %1886 = vrcp.f32 %v1051_v63  ;;  %v584_v15 = vpop.permute.xlu1 %583  ;;  %v1906_v63 = vld [vmem:[%s2876_s0 + $0x88] sm:$0xff] }
 0x354   :  { %v1869_v0 = vpop.eup %1868  ;;  %v1054_v5 = vadd.f32 1.0, %v1867_v13  ;;  %v2494_v7 = vmul.f32 %v1904_v53, %v584_v15 }
 0x355   :  { %1126 = vperm.xlu0 %1767, %v1863_v9   ;;  %v1871_v61 = vpop.eup %1870 }
 0x356   :  { %v1873_v6 = vpop.eup %1872  ;;  %1888 = vrcp.f32 %v1054_v5  ;;  %v664_v13 = vsel %vm70_vm0, %v2494_v7, 0.0 }
 0x357   :  { %628 = vperm.xlu1 %1766, %v1865_v12   ;;  %v1875_v10 = vpop.eup %1874  ;;  %v599_v46 = vpop.permute.xlu1 %598  ;;  %v662_v12 = vsel %vm70_vm0, %v2489_v3, 0.0 }
 0x358   :  { %v1877_v11 = vpop.eup %1876  ;;  %v1053_v23 = vadd.f32 1.0, %v1875_v10  ;;  %v2550_v33 = vmul.f32 %v1912_v47, %v599_v46 }
 0x359   :  { %1121 = vperm.xlu0 %1767, %v1869_v0   ;;  %v1879_v16 = vpop.eup %1878 }
 0x35a   :  { %v1881_v49 = vpop.eup %1880  ;;  %1890 = vrcp.f32 %v1053_v23  ;;  %v1055_v28 = vadd.f32 1.0, %v1879_v16  ;;  %v1909_v23 = vld [vmem:[%s2876_s0 + $0x30] sm:$0xff]  ;;  %v670_v46 = vsel %vm70_vm0, %v2550_v33, 0.0 }
 0x35b   :  { %633 = vperm.xlu1 %1766, %v1871_v61   ;;  %v594_v44 = vpop.permute.xlu1 %593  ;;  %v1907_v61 = vld [vmem:[%s2876_s0 + $0x90] sm:$0xff] }
 0x35c   :  { %1892 = vrcp.f32 %v1055_v28 }
 0x35d   :  { %1136 = vperm.xlu0 %1767, %v1873_v6   ;;  %v1883_v27 = vpop.eup %1882  ;;  %v663_v6 = vadd.f32 %v662_v12, %v661_v41  ;;  %v1918_v41 = vld [vmem:[%s2876_s0 + $0x58] sm:$0xff] }
 0x35e   :  { %v1885_v32 = vpop.eup %1884 }
 0x35f   :  { %638 = vperm.xlu1 %1766, %v1877_v11   ;;  %v1056_v14 = vadd.f32 1.0, %v1885_v32  ;;  %v604_v50 = vpop.permute.xlu1 %603  ;;  %v1908_v11 = vld [vmem:[%s2876_s0 + $0x28] sm:$0xff]  ;;  %v665_v28 = vadd.f32 %v664_v13, %v663_v6 }
 0x360   :  { %v1887_v35 = vpop.eup %1886  ;;  %v2518_v16 = vmul.f32 %v1908_v11, %v589_v30  ;;  %v2557_v30 = vmul.f32 %v1913_v39, %v604_v50  ;;  %v1915_v50 = vld [vmem:[%s2876_s0 + $0xa8] sm:$0xff]  ;;  %v1921_v11 = vld [vmem:[%s2876_s0 + $0xc0] sm:$0xff] }
 0x361   :  { %1131 = vperm.xlu0 %1767, %v1881_v49   ;;  %1894 = vrcp.f32 %v1056_v14  ;;  %v2523_v49 = vmul.f32 %v1909_v23, %v594_v44 }
 0x363   :  { %v1889_v20 = vpop.eup %1888  ;;  %1234 = vrot.lane.b32.xlu1 %v53_v37, %s1936_s1 }
 0x365   :  { %1146 = vperm.xlu0 %1767, %v1883_v27  }
 0x367   :  { %v1891_v19 = vpop.eup %1890 }
 0x369   :  { %1141 = vperm.xlu0 %1767, %v1887_v35   ;;  %v1893_v17 = vpop.eup %1892 }
 0x36d   :  { %1156 = vperm.xlu0 %1767, %v1889_v20  }
 0x36e   :  { %v1895_v21 = vpop.eup %1894 }
 0x371   :  { %1151 = vperm.xlu0 %1767, %v1891_v19  }
 0x375   :  { %1161 = vperm.xlu0 %1767, %v1893_v17   ;;  %v666_v17 = vsel %vm70_vm0, %v2518_v16, 0.0 }
 0x376   :  { %v667_v22 = vadd.f32 %v666_v17, %v665_v28 }
 0x379   :  { %1166 = vperm.xlu0 %1767, %v1895_v21   ;;  %v668_v21 = vsel %vm70_vm0, %v2523_v49, 0.0 }
 0x37a   :  { %v669_v37 = vadd.f32 %v668_v21, %v667_v22  ;;  %v1923_v22 = vld [vmem:[%s2876_s0 + $0x70] sm:$0xff] }
 0x37c   :  { %v671_v57 = vadd.f32 %v670_v46, %v669_v37 }
 0x3bc   :  { %v1097_v52 = vpop.permute.xlu0 %1096 }
 0x3bd   :  { %v2508_v0 = vmul.f32 %v1906_v63, %v1097_v52  ;;  %v1914_v52 = vld [vmem:[%s2876_s0 + $0x48] sm:$0xff] }
 0x3be   :  { %v1092_v26 = vpop.permute.xlu1 %1091 }
 0x3bf   :  { %v2499_v4 = vmul.f32 %v1905_v8, %v1092_v26  ;;  %v1186_v14 = vsel %vm70_vm0, %v2508_v0, 0.0 }
 0x3c0   :  { %v1107_v42 = vpop.permute.xlu0 %1106 }
 0x3c1   :  { %v1185_v27 = vsel %vm70_vm0, %v2499_v4, 0.0  ;;  %v2540_v43 = vmul.f32 %v1910_v24, %v1107_v42  ;;  %v1916_v42 = vld [vmem:[%s2876_s0 + $0xb0] sm:$0xff] }
 0x3c2   :  { %v609_v58 = vpop.permute.xlu1 %608  ;;  %v1187_v20 = vadd.f32 %v1186_v14, %v1185_v27 }
 0x3c3   :  { %v1190_v15 = vsel %vm70_vm0, %v2540_v43, 0.0  ;;  %v2568_v26 = vmul.f32 %v1914_v52, %v609_v58  ;;  %v672_v58 = vsel %vm70_vm0, %v2557_v30, 0.0 }
 0x3c4   :  { %v1102_v55 = vpop.permute.xlu0 %1101  ;;  %v673_v12 = vadd.f32 %v672_v58, %v671_v57  ;;  %v1926_v57 = vld [vmem:[%s2876_s0 + $0xd0] sm:$0xff] }
 0x3c5   :  { %v2513_v5 = vmul.f32 %v1907_v61, %v1102_v55  ;;  %v674_v2 = vsel %vm70_vm0, %v2568_v26, 0.0  ;;  %v1919_v61 = vld [vmem:[%s2876_s0 + $0x60] sm:$0xff] }
 0x3c6   :  { %v614_v40 = vpop.permute.xlu1 %613  ;;  %v675_v27 = vadd.f32 %v674_v2, %v673_v12  ;;  %v1927_v12 = vld [vmem:[%s2876_s0 + $0xd8] sm:$0xff] }
 0x3c7   :  { %v1188_v35 = vsel %vm70_vm0, %v2513_v5, 0.0  ;;  %v2586_v1 = vmul.f32 %v1917_v60, %v614_v40 }
 0x3c8   :  { %v1117_v36 = vpop.permute.xlu0 %1116  ;;  %v1189_v31 = vadd.f32 %v1188_v35, %v1187_v20 }
 0x3c9   :  { %v2573_v18 = vmul.f32 %v1915_v50, %v1117_v36  ;;  %v676_v40 = vsel %vm70_vm0, %v2586_v1, 0.0 }
 0x3ca   :  { %v619_v9 = vpop.permute.xlu1 %618  ;;  %v1191_v48 = vadd.f32 %v1190_v15, %v1189_v31  ;;  %v677_v20 = vadd.f32 %v676_v40, %v675_v27  ;;  %v1924_v15 = vld [vmem:[%s2876_s0 + $0xc8] sm:$0xff]  ;;  %v1929_v27 = vld [vmem:[%s2876_s0 + $0xe0] sm:$0xff] }
 0x3cb   :  { %v1194_v53 = vsel %vm70_vm0, %v2573_v18, 0.0  ;;  %v2595_v36 = vmul.f32 %v1918_v41, %v619_v9  ;;  %v1920_v9 = vld [vmem:[%s2876_s0 + $0xb8] sm:$0xff] }
 0x3cc   :  { %v1112_v10 = vpop.permute.xlu0 %1111 }
 0x3cd   :  { %v2545_v29 = vmul.f32 %v1911_v25, %v1112_v10  ;;  %v678_v14 = vsel %vm70_vm0, %v2595_v36, 0.0 }
 0x3ce   :  { %v624_v32 = vpop.permute.xlu1 %623  ;;  %v679_v37 = vadd.f32 %v678_v14, %v677_v20 }
 0x3cf   :  { %v1192_v44 = vsel %vm70_vm0, %v2545_v29, 0.0  ;;  %v2605_v6 = vmul.f32 %v1919_v61, %v624_v32  ;;  %v1922_v32 = vld [vmem:[%s2876_s0 + $0x68] sm:$0xff] }
 0x3d0   :  { %v2531_v19 = vpop.permute.xlu0 %1126  ;;  %v1193_v59 = vadd.f32 %v1192_v44, %v1191_v48  ;;  %v1925_v48 = vld [vmem:[%s2876_s0 + $0x78] sm:$0xff] }
 0x3d1   :  { %v1176_v10 = vmul.f32 %v1920_v9, %v2531_v19  ;;  %v680_v24 = vsel %vm70_vm0, %v2605_v6, 0.0 }
 0x3d2   :  { %v629_v38 = vpop.permute.xlu1 %628  ;;  %v1195_v13 = vadd.f32 %v1194_v53, %v1193_v59  ;;  %v681_v52 = vadd.f32 %v680_v24, %v679_v37 }
 0x3d3   :  { %v2620_v35 = vmul.f32 %v1922_v32, %v629_v38  ;;  %v1198_v25 = vsel %vm70_vm0, %v1176_v10, 0.0 }
 0x3d4   :  { %v2552_v45 = vpop.permute.xlu0 %1121 }
 0x3d5   :  { %v1175_v54 = vmul.f32 %v1916_v42, %v2552_v45  ;;  %v682_v39 = vsel %vm70_vm0, %v2620_v35, 0.0 }
 0x3d6   :  { %v634_v62 = vpop.permute.xlu1 %633  ;;  %v683_v58 = vadd.f32 %v682_v39, %v681_v52 }
 0x3d7   :  { %v1196_v8 = vsel %vm70_vm0, %v1175_v54, 0.0  ;;  %v2630_v31 = vmul.f32 %v1923_v22, %v634_v62  ;;  %v1930_v22 = vld [vmem:[%s2876_s0 + $0xf0] sm:$0xff] }
 0x3d8   :  { %v2579_v55 = vpop.permute.xlu0 %1136  ;;  %v1197_v28 = vadd.f32 %v1196_v8, %v1195_v13 }
 0x3d9   :  { %v1178_v44 = vmul.f32 %v1924_v15, %v2579_v55  ;;  %v684_v54 = vsel %vm70_vm0, %v2630_v31, 0.0 }
 0x3da   :  { %v639_v17 = vpop.permute.xlu1 %638  ;;  %v1199_v38 = vadd.f32 %v1198_v25, %v1197_v28  ;;  %v685_v53 = vadd.f32 %v684_v54, %v683_v58 }
 0x3db   :  { %v2642_v46 = vmul.f32 %v1925_v48, %v639_v17  ;;  %v1202_v60 = vsel %vm70_vm0, %v1178_v44, 0.0  ;;  %v1931_v44 = vld [vmem:[%s2876_s0 + $0xf8] sm:$0xff] }
 0x3dc   :  { %v2598_v63 = vpop.permute.xlu0 %1131 }
 0x3dd   :  { %v1177_v23 = vmul.f32 %v1921_v11, %v2598_v63  ;;  %v686_v62 = vsel %vm70_vm0, %v2642_v46, 0.0  ;;  %v1928_v11 = vld [vmem:[%s2876_s0 + $0xe8] sm:$0xff] }
 0x3de   :  { %v687_v40 = vadd.f32 %v686_v62, %v685_v53  ;;  %v1235_v62 = vpop.permute.xlu1 %1234 }
 0x3df   :  { %v1200_v47 = vsel %vm70_vm0, %v1177_v23, 0.0  ;;  %1759 = vpush %v1235_v62 }
 0x3e0   :  { %v2622_v21 = vpop.permute.xlu0 %1146  ;;  %v1201_v50 = vadd.f32 %v1200_v47, %v1199_v38  ;;  %v688_v14 = vrot.slane %v687_v40, 4 }
 0x3e1   :  { %v1180_v13 = vmul.f32 %v1927_v12, %v2622_v21 }
 0x3e2   :  { %v1203_v41 = vadd.f32 %v1202_v60, %v1201_v50  ;;  %v689_v37 = vadd.f32 %v688_v14, %v687_v40 }
 0x3e3   :  { %v1206_v10 = vsel %vm70_vm0, %v1180_v13, 0.0 }
 0x3e4   :  { %v2644_v42 = vpop.permute.xlu0 %1141  ;;  %v690_v52 = vrot.slane %v689_v37, 2 }
 0x3e5   :  { %v1179_v59 = vmul.f32 %v1926_v57, %v2644_v42 }
 0x3e7   :  { %v1204_v2 = vsel %vm70_vm0, %v1179_v59, 0.0  ;;  %v691_v59 = vadd.f32 %v690_v52, %v689_v37  ;;  %v1515_v37 = vld [vmem:[%s2876_s0 + $0xb0] sm:$0xff] }
 0x3e8   :  { %v2656_v8 = vpop.permute.xlu0 %1156  ;;  %v1205_v61 = vadd.f32 %v1204_v2, %v1203_v41  ;;  %v1519_v52 = vld [vmem:[%s2876_s0 + $0xd0] sm:$0xff] }
 0x3e9   :  { %v1182_v23 = vmul.f32 %v1928_v11, %v2656_v8  ;;  %v692_v2 = vrot.slane %v691_v59, 1 }
 0x3ea   :  { %v1207_v32 = vadd.f32 %v1206_v10, %v1205_v61 }
 0x3eb   :  { %v1210_v25 = vsel %vm70_vm0, %v1182_v23, 0.0  ;;  %v693_v12 = vadd.f32 %v692_v2, %v691_v59  ;;  %v1523_v59 = vld [vmem:[%s2876_s0 + $0xf0] sm:$0xff]  ;;  %v1376_v2 = vmul.f32 %v1515_v37, %v2552_v45 }
 0x3ec   :  { %v2662_v9 = vpop.permute.xlu0 %1151 }
 0x3ed   :  { %v1181_v28 = vmul.f32 %v1929_v27, %v2662_v9  ;;  %v695_v61 = vmul.f32 0.0078125, %v693_v12 }
 0x3ef   :  { %v1208_v20 = vsel %vm70_vm0, %v1181_v28, 0.0 }
 0x3f0   :  { %v1209_v17 = vadd.f32 %v1208_v20, %v1207_v32  ;;  %v2674_v24 = vpop.permute.xlu0 %1161 }
 0x3f1   :  { %v1183_v47 = vmul.f32 %v1930_v22, %v2674_v24 }
 0x3f2   :  { %v1211_v38 = vadd.f32 %v1210_v25, %v1209_v17  ;;  %v1318_v25 = vlaneseq }
 0x3f3   :  { %v1212_v39 = vsel %vm70_vm0, %v1183_v47, 0.0  ;;  %v1516_v47 = vld [vmem:[%s2876_s0 + $0xb8] sm:$0xff] }
 0x3f4   :  { %v1167_v15 = vpop.permute.xlu0 %1166  ;;  %v1213_v50 = vadd.f32 %v1212_v39, %v1211_v38  ;;  %v1319_v22 = vshrl.u32 %v1318_v25, 7  ;;  %v1518_v38 = vld [vmem:[%s2876_s0 + $0xc8] sm:$0xff]  ;;  %v1517_v39 = vld [vmem:[%s2876_s0 + $0xc0] sm:$0xff]  ;;  %v1377_v62 = vmul.f32 %v1516_v47, %v2531_v19 }
 0x3f5   :  { %v1184_v48 = vmul.f32 %v1931_v44, %v1167_v15 }
 0x3f6   :  { %v1320_v44 = vsub.s32 0, %v1319_v22 }
 0x3f7   :  { %v1214_v54 = vsel %vm70_vm0, %v1184_v48, 0.0  ;;  %v1520_v48 = vld [vmem:[%s2876_s0 + $0xd8] sm:$0xff] }
 0x3f8   :  { %v1215_v57 = vadd.f32 %v1214_v54, %v1213_v50  ;;  %v1522_v50 = vld [vmem:[%s2876_s0 + $0xe8] sm:$0xff]  ;;  %v1388_v54 = vsub.s32 1, %v1319_v22  ;;  %v1381_v12 = vmul.f32 %v1520_v48, %v2622_v21 }
 0x3fa   :  { %v1216_v58 = vrot.slane %v1215_v57, 4 }
 0x3fc   :  { %v1217_v60 = vadd.f32 %v1216_v58, %v1215_v57  ;;  %v1521_v57 = vld [vmem:[%s2876_s0 + $0xe0] sm:$0xff]  ;;  %v1524_v58 = vld [vmem:[%s2876_s0 + $0xf8] sm:$0xff] }
 0x3fe   :  { %v1218_v53 = vrot.slane %v1217_v60, 2 }
 0x400   :  { %v1219_v41 = vadd.f32 %v1218_v53, %v1217_v60  ;;  %v1379_v53 = vmul.f32 %v1518_v38, %v2579_v55 }
 0x402   :  { %v1220_v13 = vrot.slane %v1219_v41, 1 }
 0x404   :  { %v1221_v40 = vadd.f32 %v1220_v13, %v1219_v41  ;;  %v1378_v41 = vmul.f32 %v1517_v39, %v2598_v63  ;;  %v1380_v13 = vmul.f32 %v1519_v52, %v2644_v42 }
 0x406   :  { %v1222_v10 = vmul.f32 0.0078125, %v1221_v40  ;;  %v1383_v40 = vmul.f32 %v1522_v50, %v2656_v8 }
 0x408   :  { %v1224_v11 = vsel %vm1223_vm3, %v695_v61, %v1222_v10  ;;  %v1382_v10 = vmul.f32 %v1521_v57, %v2662_v9 }
 0x409   :  { %1757 = vmatmul.mubr.msk.f32.vlgmr.msra.gmra.mxu1 %vm70_vm0, %v1224_v11  ;;  %v1384_v11 = vmul.f32 %v1523_v59, %v2674_v24 }
 0x410   :  { %s1760_s18 = spop %1759 }
 0x411   :  { %v1237_v23 = vstv %s1760_s18 }
 0x4c9   :  { %v1308_v27 = vpop.f32.mrf.mxu1 }
 0x4ca   :  { %v1309_v28 = vadd.f32 %v1308_v27, %v1237_v23  ;;  %v1385_v23 = vmul.f32 %v1524_v58, %v1167_v15 }
 0x4cb   :  { %v1758_v14 = vpop.f32.mrf.mxu1 }
 0x4cc   :  { %v1508_v32 = vmul.f32 -1.442695, %v1309_v28 }
 0x4ce   :  { %1896 = vpow2.f32 %v1508_v32 }
 0x4db   :  { %v1897_v20 = vpop.eup %1896 }
 0x4dc   :  { %v1315_v17 = vadd.f32 1.0, %v1897_v20 }
 0x4de   :  { %1898 = vrcp.f32 %v1315_v17 }
 0x4eb   :  { %v1899_v60 = vpop.eup %1898 }
 0x4ec   :  { %v1321_v61 = vrot.slane %v1899_v60, %v1320_v44  ;;  %v1389_v27 = vrot.slane %v1899_v60, %v1388_v54 }
 0x4ee   :  { %v1322_v19 = vmul.f32 %v1321_v61, %v2468_v51  ;;  %v1323_v45 = vmul.f32 %v1321_v61, %v2473_v56  ;;  %v1324_v55 = vmul.f32 %v1321_v61, %v2478_v34  ;;  %v1325_v63 = vmul.f32 %v1321_v61, %v2489_v3 }
 0x4ef   :  { %v1326_v21 = vmul.f32 %v1321_v61, %v2494_v7  ;;  %v1327_v42 = vmul.f32 %v1321_v61, %v2518_v16  ;;  %v1328_v8 = vmul.f32 %v1321_v61, %v2523_v49  ;;  %v1329_v9 = vmul.f32 %v1321_v61, %v2550_v33 }
 0x4f0   :  { %v1330_v24 = vmul.f32 %v1321_v61, %v2557_v30  ;;  %v1331_v15 = vmul.f32 %v1321_v61, %v2568_v26  ;;  %v1332_v51 = vmul.f32 %v1321_v61, %v2586_v1  ;;  %v1333_v56 = vmul.f32 %v1321_v61, %v2595_v36  ;;  %1338 = vst.msk [vmem:[%s2881_s5] sm:$0xff] %vm70_vm0, %v1322_v19 }
 0x4f1   :  { %1339 = vst.msk [vmem:[%s2881_s5 + $0x8] sm:$0xff] %vm70_vm0, %v1323_v45  ;;  %1340 = vst.msk [vmem:[%s2881_s5 + $0x10] sm:$0xff] %vm70_vm0, %v1324_v55  ;;  %v1334_v34 = vmul.f32 %v1321_v61, %v2605_v6  ;;  %v1335_v3 = vmul.f32 %v1321_v61, %v2620_v35  ;;  %v1336_v7 = vmul.f32 %v1321_v61, %v2630_v31 }
 0x4f2   :  { %1341 = vst.msk [vmem:[%s2881_s5 + $0x18] sm:$0xff] %vm70_vm0, %v1325_v63  ;;  %v1337_v16 = vmul.f32 %v1321_v61, %v2642_v46  ;;  %1342 = vst.msk [vmem:[%s2881_s5 + $0x20] sm:$0xff] %vm70_vm0, %v1326_v21  ;;  %v1390_v49 = vmul.f32 %v1389_v27, %v2499_v4  ;;  %v1391_v33 = vmul.f32 %v1389_v27, %v2508_v0 }
 0x4f3   :  { %1343 = vst.msk [vmem:[%s2881_s5 + $0x28] sm:$0xff] %vm70_vm0, %v1327_v42  ;;  %1344 = vst.msk [vmem:[%s2881_s5 + $0x30] sm:$0xff] %vm70_vm0, %v1328_v8  ;;  %v1392_v30 = vmul.f32 %v1389_v27, %v2513_v5  ;;  %v1393_v26 = vmul.f32 %v1389_v27, %v2540_v43  ;;  %v1394_v4 = vmul.f32 %v1389_v27, %v2545_v29 }
 0x4f4   :  { %1345 = vst.msk [vmem:[%s2881_s5 + $0x38] sm:$0xff] %vm70_vm0, %v1329_v9  ;;  %1346 = vst.msk [vmem:[%s2881_s5 + $0x40] sm:$0xff] %vm70_vm0, %v1330_v24  ;;  %v1395_v0 = vmul.f32 %v1389_v27, %v2573_v18  ;;  %v1396_v5 = vmul.f32 %v1389_v27, %v1376_v2  ;;  %v1397_v43 = vmul.f32 %v1389_v27, %v1377_v62 }
 0x4f5   :  { %1347 = vst.msk [vmem:[%s2881_s5 + $0x48] sm:$0xff] %vm70_vm0, %v1331_v15  ;;  %1348 = vst.msk [vmem:[%s2881_s5 + $0x50] sm:$0xff] %vm70_vm0, %v1332_v51  ;;  %v1398_v1 = vmul.f32 %v1389_v27, %v1378_v41  ;;  %v1399_v36 = vmul.f32 %v1389_v27, %v1379_v53  ;;  %v1400_v6 = vmul.f32 %v1389_v27, %v1380_v13 }
 0x4f6   :  { %1349 = vst.msk [vmem:[%s2881_s5 + $0x58] sm:$0xff] %vm70_vm0, %v1333_v56  ;;  %1350 = vst.msk [vmem:[%s2881_s5 + $0x60] sm:$0xff] %vm70_vm0, %v1334_v34  ;;  %v1401_v35 = vmul.f32 %v1389_v27, %v1381_v12  ;;  %v1402_v29 = vmul.f32 %v1389_v27, %v1382_v10  ;;  %v1403_v18 = vmul.f32 %v1389_v27, %v1383_v40 }
 0x4f7   :  { %1351 = vst.msk [vmem:[%s2881_s5 + $0x68] sm:$0xff] %vm70_vm0, %v1335_v3  ;;  %1352 = vst.msk [vmem:[%s2881_s5 + $0x70] sm:$0xff] %vm70_vm0, %v1336_v7  ;;  %v1404_v31 = vmul.f32 %v1389_v27, %v1384_v11  ;;  %v1405_v46 = vmul.f32 %v1389_v27, %v1385_v23 }
 0x4f8   :  { %1353 = vst.msk [vmem:[%s2881_s5 + $0x78] sm:$0xff] %vm70_vm0, %v1337_v16  ;;  %1525 = vst.msk [vmem:[%s2881_s5 + $0x80] sm:$0xff] %vm70_vm0, %v1390_v49 }
 0x4f9   :  { %1526 = vst.msk [vmem:[%s2881_s5 + $0x88] sm:$0xff] %vm70_vm0, %v1391_v33  ;;  %1527 = vst.msk [vmem:[%s2881_s5 + $0x90] sm:$0xff] %vm70_vm0, %v1392_v30 }
 0x4fa   :  { %1528 = vst.msk [vmem:[%s2881_s5 + $0x98] sm:$0xff] %vm70_vm0, %v1393_v26  ;;  %1529 = vst.msk [vmem:[%s2881_s5 + $0xa0] sm:$0xff] %vm70_vm0, %v1394_v4 }
 0x4fb   :  { %1530 = vst.msk [vmem:[%s2881_s5 + $0xa8] sm:$0xff] %vm70_vm0, %v1395_v0  ;;  %1531 = vst.msk [vmem:[%s2881_s5 + $0xb0] sm:$0xff] %vm70_vm0, %v1396_v5 }
 0x4fc   :  { %1532 = vst.msk [vmem:[%s2881_s5 + $0xb8] sm:$0xff] %vm70_vm0, %v1397_v43  ;;  %1533 = vst.msk [vmem:[%s2881_s5 + $0xc0] sm:$0xff] %vm70_vm0, %v1398_v1 }
 0x4fd   :  { %1534 = vst.msk [vmem:[%s2881_s5 + $0xc8] sm:$0xff] %vm70_vm0, %v1399_v36  ;;  %1535 = vst.msk [vmem:[%s2881_s5 + $0xd0] sm:$0xff] %vm70_vm0, %v1400_v6 }
 0x4fe   :  { %1536 = vst.msk [vmem:[%s2881_s5 + $0xd8] sm:$0xff] %vm70_vm0, %v1401_v35  ;;  %1537 = vst.msk [vmem:[%s2881_s5 + $0xe0] sm:$0xff] %vm70_vm0, %v1402_v29 }
 0x4ff   :  { %1538 = vst.msk [vmem:[%s2881_s5 + $0xe8] sm:$0xff] %vm70_vm0, %v1403_v18  ;;  %1539 = vst.msk [vmem:[%s2881_s5 + $0xf0] sm:$0xff] %vm70_vm0, %v1404_v31 }
 0x500   :  { %1540 = vst.msk [vmem:[%s2881_s5 + $0xf8] sm:$0xff] %vm70_vm0, %v1405_v46 }

</bundles_post_ra>
